<compile_context>
chip_gen: v6e
topology: v6e:2x2x1
jax: 0.10.0
libtpu: 0.0.40
codegen_flags: <defaults>
</compile_context>

<pallas_src>
import functools

import jax
import jax.numpy as jnp
from jax.experimental import pallas as pl
from jax.experimental.pallas import tpu as pltpu

EPS = 1e-5  # PyTorch BatchNorm2d default


# ----------------------------------------------------------------------------
# In-kernel helper: 3x3 same-padded conv, channel-major, 9 accumulated matmuls
# ----------------------------------------------------------------------------
def _conv3x3_flat(src_ref, w_ref, mask_ref, *, H, W):
    """src_ref : (C_in, H*W + 2*W + 2) bf16 ref -- image flattened row-major,
                 one zero row above/below plus one extra zero element at each
                 end, so every tap window is a contiguous lane slice.
       w_ref   : (9, C_out, C_in) bf16 ref, tap index t = kh*3 + kw.
       mask_ref: (2, H*W) bf16; row 0 zeros column w==0 (kw==0 taps), row 1
                 zeros column w==W-1 (kw==2 taps) -- those lanes wrap to the
                 neighbouring image row in the flattened layout.
       Returns (C_out, H*W) float32."""
    HW = H * W
    cout = w_ref.shape[1]
    acc = jnp.zeros((cout, HW), jnp.float32)
    for kh in range(3):
        for kw in range(3):
            s = kh * W + kw
            win = src_ref[:, s:s + HW]           # contiguous lane slice
            if kw == 0:
                win = win * mask_ref[0:1, :]
            elif kw == 2:
                win = win * mask_ref[1:2, :]
            acc = acc + jnp.dot(w_ref[kh * 3 + kw], win,
                                preferred_element_type=jnp.float32)
    return acc


# ----------------------------------------------------------------------------
# Pass 1: per-image BN statistics only (tiny HBM writes)
# ----------------------------------------------------------------------------
def _stem_stats_kernel(x_ref, w1_ref, mask_ref, s_ref, q_ref, *, H, W):
    # acc rows [:Cout] = conv3x3(x) (no bias), rows [Cout:] = conv1x1 shortcut.
    acc = _conv3x3_flat(x_ref, w1_ref, mask_ref, H=H, W=W)
    s_ref[...] = jnp.sum(acc, axis=1, keepdims=True)
    q_ref[...] = jnp.sum(acc * acc, axis=1, keepdims=True)


# ----------------------------------------------------------------------------
# Pass 2: conv -> BN+ReLU -> conv -> (+ shortcut-BN) fully fused
# ----------------------------------------------------------------------------
def _stem_fused_kernel(x_ref, w1_ref, w2_ref, mask_ref, bn_ref, o_ref, act_ref,
                       *, H, W):
    HW = H * W
    cout = w2_ref.shape[1]

    acc = _conv3x3_flat(x_ref, w1_ref, mask_ref, H=H, W=W)   # (2*Cout, HW)
    c1 = acc[:cout]
    sc = acc[cout:]

    # Folded batch-stat BatchNorm + ReLU (epilogue of conv #1).
    act = jnp.maximum(c1 * bn_ref[:, 0:1] + bn_ref[:, 1:2], 0.0)

    # Flattened, height-padded activation for conv #2.  Only the (W+1)-lane
    # halo at each end needs zeroing; do it every step (cheap) rather than
    # under pl.when(step==0), which would miss the second core when the grid
    # is sharded across TensorCores.
    act_ref[:, :W + 1] = jnp.zeros((cout, W + 1), act_ref.dtype)
    act_ref[:, HW + W + 1:] = jnp.zeros((cout, W + 1), act_ref.dtype)
    act_ref[:, W + 1:W + 1 + HW] = act.astype(act_ref.dtype)

    cb = _conv3x3_flat(act_ref, w2_ref, mask_ref, H=H, W=W)   # (Cout, HW)

    # Residual add with the (no-relu) shortcut BN folded in; the second conv's
    # bias is pre-folded into bn_ref[:, 3].  Fully lane-dense store.
    o_ref[...] = cb + sc * bn_ref[:, 2:3] + bn_ref[:, 3:4]


# ----------------------------------------------------------------------------
# Wrapper
# ----------------------------------------------------------------------------
def stem_block_forward(x_nchw, p):
    N, Cin, H, W = x_nchw.shape
    Cout = p["w_conv"].shape[0]
    HW = H * W
    L = HW + 2 * W + 2          # flattened length incl. 1-row halo + 2 extras
    M = N * HW

    # Channel-major, spatially-flattened input: one zero row above/below (plus
    # one zero element at each end) so every conv tap is a contiguous lane
    # slice of length H*W.  Cast to bf16 once (MXU operand dtype).
    xflat = jnp.pad(x_nchw.astype(jnp.bfloat16).reshape(N, Cin, HW),
                    ((0, 0), (0, 0), (W + 1, W + 1)))

    # conv3x3 + 1x1 shortcut fused into one (9, 2*Cout, Cin) tap-weight stack:
    # rows [:Cout] = 3x3 kernel taps, rows [Cout:] of the centre tap = shortcut.
    w1 = jnp.transpose(p["w_conv"], (2, 3, 0, 1)).reshape(9, Cout, Cin)
    w1c = jnp.zeros((9, 2 * Cout, Cin), jnp.float32)
    w1c = w1c.at[:, :Cout, :].set(w1)
    w1c = w1c.at[4, Cout:, :].set(p["w_sc"].reshape(Cout, Cin))
    w1c = w1c.astype(jnp.bfloat16)
    w2 = jnp.transpose(p["w_cb"], (2, 3, 0, 1)).reshape(9, Cout, Cout)
    w2 = w2.astype(jnp.bfloat16)
    # NOTE: conv biases b_conv / b_sc are exactly absorbed by the
    # immediately-following training-mode BatchNorms and are dropped.

    # Width-boundary masks for the flattened layout (left/right neighbour of a
    # boundary column wraps to the adjacent image row -> zero it).
    col = jnp.arange(HW, dtype=jnp.int32) % W
    masks = jnp.stack([(col != 0), (col != W - 1)], axis=0).astype(jnp.bfloat16)

    def rep(shape):  # replicated (weight-like) operand, same block every step
        return pl.BlockSpec(shape, lambda n, _r=len(shape): (0,) * _r)

    # ---- pass 1: per-image sums / sums-of-squares for both BatchNorms -------
    stat_spec = pl.BlockSpec((None, 2 * Cout, 1), lambda n: (n, 0, 0))
    s1, q1 = pl.pallas_call(
        functools.partial(_stem_stats_kernel, H=H, W=W),
        out_shape=(jax.ShapeDtypeStruct((N, 2 * Cout, 1), jnp.float32),) * 2,
        grid=(N,),
        in_specs=[
            pl.BlockSpec((None, Cin, L), lambda n: (n, 0, 0)),
            rep((9, 2 * Cout, Cin)),
            rep((2, HW)),
        ],
        out_specs=(stat_spec, stat_spec),
        compiler_params=pltpu.CompilerParams(dimension_semantics=("parallel",)),
    )(xflat, w1c, masks)

    # ---- fold training-mode BN (biased batch variance) into scale/shift -----
    ssum = jnp.sum(s1, axis=0)[:, 0]
    qsum = jnp.sum(q1, axis=0)[:, 0]

    def fold_bn(ss, qq, gamma, beta):
        mean = ss / M
        var = jnp.maximum(qq / M - mean * mean, 0.0)   # guard f32 cancellation
        scale = gamma * jax.lax.rsqrt(var + EPS)
        return scale, beta - mean * scale

    scale_cb, shift_cb = fold_bn(ssum[:Cout], qsum[:Cout],
                                 p["gamma_cb"], p["beta_cb"])
    scale_sc, shift_sc = fold_bn(ssum[Cout:], qsum[Cout:],
                                 p["gamma_sc"], p["beta_sc"])
    shift_sc = shift_sc + p["b_cb"]                    # fold 2nd conv bias in
    bnp = jnp.stack([scale_cb, shift_cb, scale_sc, shift_sc],
                    axis=1).astype(jnp.float32)        # (Cout, 4)

    # ---- pass 2: fully fused forward ----------------------------------------
    out = pl.pallas_call(
        functools.partial(_stem_fused_kernel, H=H, W=W),
        out_shape=jax.ShapeDtypeStruct((N, Cout, HW), jnp.float32),
        grid=(N,),
        in_specs=[
            pl.BlockSpec((None, Cin, L), lambda n: (n, 0, 0)),
            rep((9, 2 * Cout, Cin)),
            rep((9, Cout, Cout)),
            rep((2, HW)),
            rep((Cout, 4)),
        ],
        out_specs=pl.BlockSpec((None, Cout, HW), lambda n: (n, 0, 0)),
        scratch_shapes=[pltpu.VMEM((Cout, L), jnp.bfloat16)],
        compiler_params=pltpu.CompilerParams(dimension_semantics=("parallel",)),
    )(xflat, w1c, w2, masks, bnp)

    return out.reshape(N, Cout, H, W)                  # already channel-major


# ----------------------------------------------------------------------------
# Deterministic parameter init (synthetic; shapes from Stem_block.__init__)
# ----------------------------------------------------------------------------
def init_params(key, in_ch, out_ch):
    ks = jax.random.split(key, 8)

    def rnd(k, shape, s=0.1):
        return (s * jax.random.normal(k, shape)).astype(jnp.float32)

    return {
        # self.conv: Conv2d(in_ch, out_ch, 3, padding=1)   (PyTorch OIHW)
        "w_conv": rnd(ks[0], (out_ch, in_ch, 3, 3)),
        "b_conv": rnd(ks[1], (out_ch,)),   # absorbed by the following BN
        # self.CB.conv: Conv2d(out_ch, out_ch, 3, padding=1)
        "w_cb": rnd(ks[2], (out_ch, out_ch, 3, 3)),
        "b_cb": rnd(ks[3], (out_ch,)),
        # self.CB.bn_relu.bn: BatchNorm2d(out_ch)
        "gamma_cb": 1.0 + rnd(ks[4], (out_ch,)),
        "beta_cb": rnd(ks[5], (out_ch,)),
        # self.shortcut: Conv2d(in_ch, out_ch, 1)
        "w_sc": rnd(ks[6], (out_ch, in_ch)),
        "b_sc": rnd(ks[7], (out_ch,)),     # absorbed by the following BN
        # self.bn: BN_ReLU(out_ch, activation=False)
        "gamma_sc": jnp.ones((out_ch,), jnp.float32),
        "beta_sc": jnp.zeros((out_ch,), jnp.float32),
    }


if __name__ == "__main__":
    key = jax.random.PRNGKey(0)
    kx, kp = jax.random.split(key)

    N, in_ch, Hs, Ws = 2, 4, 16, 16
    out_ch = 8
    x = jax.random.normal(kx, (N, in_ch, Hs, Ws), dtype=jnp.float32)
    params = init_params(kp, in_ch, out_ch)

    out = jax.jit(stem_block_forward)(x, params)
    out = jax.block_until_ready(out)
    assert out.shape == (N, out_ch, Hs, Ws), out.shape
    assert bool(jnp.all(jnp.isfinite(out)))
    print("KERNEL_OK")
</pallas_src>

<mosaic_0001>
module attributes {stable_mosaic.version = 11 : i64} {
  func.func @_stem_stats_kernel(%arg0: i32, %arg1: memref<1x4x290xbf16, #tpu.memory_space<vmem>>, %arg2: memref<9x16x4xbf16, #tpu.memory_space<vmem>>, %arg3: memref<2x256xbf16, #tpu.memory_space<vmem>>, %arg4: memref<1x16x1xf32, #tpu.memory_space<vmem>>, %arg5: memref<1x16x1xf32, #tpu.memory_space<vmem>>) attributes {dimension_semantics = [#tpu.dimension_semantics<parallel>], iteration_bounds = array<i64: 2>, scalar_prefetch = 0 : i64, scratch_operands = 0 : i64, tpu.core_type = #tpu.core_type<tc>, window_params = [{transform_indices = @transform_0, window_bounds = array<i64: 1, 4, 290>}, {pipeline_mode = #tpu.pipeline_mode<synchronous>, transform_indices = @transform_1, window_bounds = array<i64: 9, 16, 4>}, {pipeline_mode = #tpu.pipeline_mode<synchronous>, transform_indices = @transform_2, window_bounds = array<i64: 2, 256>}, {transform_indices = @transform_3, window_bounds = array<i64: 1, 16, 1>}, {transform_indices = @transform_4, window_bounds = array<i64: 1, 16, 1>}]} {
    %cst = arith.constant 0.000000e+00 : f32
    %0 = vector.broadcast %cst : f32 to vector<16x256xf32>
    %c0 = arith.constant 0 : index
    %c0_0 = arith.constant 0 : index
    %c0_1 = arith.constant 0 : index
    %1 = vector.load %arg1[%c0, %c0_0, %c0_1] : memref<1x4x290xbf16, #tpu.memory_space<vmem>>, vector<1x4x256xbf16>
    %2 = vector.shape_cast %1 : vector<1x4x256xbf16> to vector<4x256xbf16>
    %c0_2 = arith.constant 0 : index
    %c0_3 = arith.constant 0 : index
    %3 = vector.load %arg3[%c0_2, %c0_3] : memref<2x256xbf16, #tpu.memory_space<vmem>>, vector<1x256xbf16>
    %4 = vector.broadcast %3 : vector<1x256xbf16> to vector<4x256xbf16>
    %5 = arith.mulf %2, %4 : vector<4x256xbf16>
    %c0_4 = arith.constant 0 : index
    %c0_5 = arith.constant 0 : index
    %c0_6 = arith.constant 0 : index
    %6 = vector.load %arg2[%c0_4, %c0_5, %c0_6] : memref<9x16x4xbf16, #tpu.memory_space<vmem>>, vector<1x16x4xbf16>
    %7 = vector.shape_cast %6 : vector<1x16x4xbf16> to vector<16x4xbf16>
    %cst_7 = arith.constant dense<0.000000e+00> : vector<16x256xf32>
    %8 = tpu.matmul %7, %5, %cst_7 {dimension_numbers = #tpu.dot_dimension_numbers<[1], [0], [0], [1], [0, 0, 1, 1], [], []>} : vector<16x4xbf16>, vector<4x256xbf16>, vector<16x256xf32> -> vector<16x256xf32>
    %9 = arith.addf %0, %8 : vector<16x256xf32>
    %c0_8 = arith.constant 0 : index
    %c0_9 = arith.constant 0 : index
    %c1 = arith.constant 1 : index
    %10 = vector.load %arg1[%c0_8, %c0_9, %c1] : memref<1x4x290xbf16, #tpu.memory_space<vmem>>, vector<1x4x256xbf16>
    %11 = vector.shape_cast %10 : vector<1x4x256xbf16> to vector<4x256xbf16>
    %c1_10 = arith.constant 1 : index
    %c0_11 = arith.constant 0 : index
    %c0_12 = arith.constant 0 : index
    %12 = vector.load %arg2[%c1_10, %c0_11, %c0_12] : memref<9x16x4xbf16, #tpu.memory_space<vmem>>, vector<1x16x4xbf16>
    %13 = vector.shape_cast %12 : vector<1x16x4xbf16> to vector<16x4xbf16>
    %cst_13 = arith.constant dense<0.000000e+00> : vector<16x256xf32>
    %14 = tpu.matmul %13, %11, %cst_13 {dimension_numbers = #tpu.dot_dimension_numbers<[1], [0], [0], [1], [0, 0, 1, 1], [], []>} : vector<16x4xbf16>, vector<4x256xbf16>, vector<16x256xf32> -> vector<16x256xf32>
    %15 = arith.addf %9, %14 : vector<16x256xf32>
    %c0_14 = arith.constant 0 : index
    %c0_15 = arith.constant 0 : index
    %c2 = arith.constant 2 : index
    %16 = vector.load %arg1[%c0_14, %c0_15, %c2] : memref<1x4x290xbf16, #tpu.memory_space<vmem>>, vector<1x4x256xbf16>
    %17 = vector.shape_cast %16 : vector<1x4x256xbf16> to vector<4x256xbf16>
    %c1_16 = arith.constant 1 : index
    %c0_17 = arith.constant 0 : index
    %18 = vector.load %arg3[%c1_16, %c0_17] : memref<2x256xbf16, #tpu.memory_space<vmem>>, vector<1x256xbf16>
    %19 = vector.broadcast %18 : vector<1x256xbf16> to vector<4x256xbf16>
    %20 = arith.mulf %17, %19 : vector<4x256xbf16>
    %c2_18 = arith.constant 2 : index
    %c0_19 = arith.constant 0 : index
    %c0_20 = arith.constant 0 : index
    %21 = vector.load %arg2[%c2_18, %c0_19, %c0_20] : memref<9x16x4xbf16, #tpu.memory_space<vmem>>, vector<1x16x4xbf16>
    %22 = vector.shape_cast %21 : vector<1x16x4xbf16> to vector<16x4xbf16>
    %cst_21 = arith.constant dense<0.000000e+00> : vector<16x256xf32>
    %23 = tpu.matmul %22, %20, %cst_21 {dimension_numbers = #tpu.dot_dimension_numbers<[1], [0], [0], [1], [0, 0, 1, 1], [], []>} : vector<16x4xbf16>, vector<4x256xbf16>, vector<16x256xf32> -> vector<16x256xf32>
    %24 = arith.addf %15, %23 : vector<16x256xf32>
    %c0_22 = arith.constant 0 : index
    %c0_23 = arith.constant 0 : index
    %c16 = arith.constant 16 : index
    %25 = vector.load %arg1[%c0_22, %c0_23, %c16] : memref<1x4x290xbf16, #tpu.memory_space<vmem>>, vector<1x4x256xbf16>
    %26 = vector.shape_cast %25 : vector<1x4x256xbf16> to vector<4x256xbf16>
    %c0_24 = arith.constant 0 : index
    %c0_25 = arith.constant 0 : index
    %27 = vector.load %arg3[%c0_24, %c0_25] : memref<2x256xbf16, #tpu.memory_space<vmem>>, vector<1x256xbf16>
    %28 = vector.broadcast %27 : vector<1x256xbf16> to vector<4x256xbf16>
    %29 = arith.mulf %26, %28 : vector<4x256xbf16>
    %c3 = arith.constant 3 : index
    %c0_26 = arith.constant 0 : index
    %c0_27 = arith.constant 0 : index
    %30 = vector.load %arg2[%c3, %c0_26, %c0_27] : memref<9x16x4xbf16, #tpu.memory_space<vmem>>, vector<1x16x4xbf16>
    %31 = vector.shape_cast %30 : vector<1x16x4xbf16> to vector<16x4xbf16>
    %cst_28 = arith.constant dense<0.000000e+00> : vector<16x256xf32>
    %32 = tpu.matmul %31, %29, %cst_28 {dimension_numbers = #tpu.dot_dimension_numbers<[1], [0], [0], [1], [0, 0, 1, 1], [], []>} : vector<16x4xbf16>, vector<4x256xbf16>, vector<16x256xf32> -> vector<16x256xf32>
    %33 = arith.addf %24, %32 : vector<16x256xf32>
    %c0_29 = arith.constant 0 : index
    %c0_30 = arith.constant 0 : index
    %c17 = arith.constant 17 : index
    %34 = vector.load %arg1[%c0_29, %c0_30, %c17] : memref<1x4x290xbf16, #tpu.memory_space<vmem>>, vector<1x4x256xbf16>
    %35 = vector.shape_cast %34 : vector<1x4x256xbf16> to vector<4x256xbf16>
    %c4 = arith.constant 4 : index
    %c0_31 = arith.constant 0 : index
    %c0_32 = arith.constant 0 : index
    %36 = vector.load %arg2[%c4, %c0_31, %c0_32] : memref<9x16x4xbf16, #tpu.memory_space<vmem>>, vector<1x16x4xbf16>
    %37 = vector.shape_cast %36 : vector<1x16x4xbf16> to vector<16x4xbf16>
    %cst_33 = arith.constant dense<0.000000e+00> : vector<16x256xf32>
    %38 = tpu.matmul %37, %35, %cst_33 {dimension_numbers = #tpu.dot_dimension_numbers<[1], [0], [0], [1], [0, 0, 1, 1], [], []>} : vector<16x4xbf16>, vector<4x256xbf16>, vector<16x256xf32> -> vector<16x256xf32>
    %39 = arith.addf %33, %38 : vector<16x256xf32>
    %c0_34 = arith.constant 0 : index
    %c0_35 = arith.constant 0 : index
    %c18 = arith.constant 18 : index
    %40 = vector.load %arg1[%c0_34, %c0_35, %c18] : memref<1x4x290xbf16, #tpu.memory_space<vmem>>, vector<1x4x256xbf16>
    %41 = vector.shape_cast %40 : vector<1x4x256xbf16> to vector<4x256xbf16>
    %c1_36 = arith.constant 1 : index
    %c0_37 = arith.constant 0 : index
    %42 = vector.load %arg3[%c1_36, %c0_37] : memref<2x256xbf16, #tpu.memory_space<vmem>>, vector<1x256xbf16>
    %43 = vector.broadcast %42 : vector<1x256xbf16> to vector<4x256xbf16>
    %44 = arith.mulf %41, %43 : vector<4x256xbf16>
    %c5 = arith.constant 5 : index
    %c0_38 = arith.constant 0 : index
    %c0_39 = arith.constant 0 : index
    %45 = vector.load %arg2[%c5, %c0_38, %c0_39] : memref<9x16x4xbf16, #tpu.memory_space<vmem>>, vector<1x16x4xbf16>
    %46 = vector.shape_cast %45 : vector<1x16x4xbf16> to vector<16x4xbf16>
    %cst_40 = arith.constant dense<0.000000e+00> : vector<16x256xf32>
    %47 = tpu.matmul %46, %44, %cst_40 {dimension_numbers = #tpu.dot_dimension_numbers<[1], [0], [0], [1], [0, 0, 1, 1], [], []>} : vector<16x4xbf16>, vector<4x256xbf16>, vector<16x256xf32> -> vector<16x256xf32>
    %48 = arith.addf %39, %47 : vector<16x256xf32>
    %c0_41 = arith.constant 0 : index
    %c0_42 = arith.constant 0 : index
    %c32 = arith.constant 32 : index
    %49 = vector.load %arg1[%c0_41, %c0_42, %c32] : memref<1x4x290xbf16, #tpu.memory_space<vmem>>, vector<1x4x256xbf16>
    %50 = vector.shape_cast %49 : vector<1x4x256xbf16> to vector<4x256xbf16>
    %c0_43 = arith.constant 0 : index
    %c0_44 = arith.constant 0 : index
    %51 = vector.load %arg3[%c0_43, %c0_44] : memref<2x256xbf16, #tpu.memory_space<vmem>>, vector<1x256xbf16>
    %52 = vector.broadcast %51 : vector<1x256xbf16> to vector<4x256xbf16>
    %53 = arith.mulf %50, %52 : vector<4x256xbf16>
    %c6 = arith.constant 6 : index
    %c0_45 = arith.constant 0 : index
    %c0_46 = arith.constant 0 : index
    %54 = vector.load %arg2[%c6, %c0_45, %c0_46] : memref<9x16x4xbf16, #tpu.memory_space<vmem>>, vector<1x16x4xbf16>
    %55 = vector.shape_cast %54 : vector<1x16x4xbf16> to vector<16x4xbf16>
    %cst_47 = arith.constant dense<0.000000e+00> : vector<16x256xf32>
    %56 = tpu.matmul %55, %53, %cst_47 {dimension_numbers = #tpu.dot_dimension_numbers<[1], [0], [0], [1], [0, 0, 1, 1], [], []>} : vector<16x4xbf16>, vector<4x256xbf16>, vector<16x256xf32> -> vector<16x256xf32>
    %57 = arith.addf %48, %56 : vector<16x256xf32>
    %c0_48 = arith.constant 0 : index
    %c0_49 = arith.constant 0 : index
    %c33 = arith.constant 33 : index
    %58 = vector.load %arg1[%c0_48, %c0_49, %c33] : memref<1x4x290xbf16, #tpu.memory_space<vmem>>, vector<1x4x256xbf16>
    %59 = vector.shape_cast %58 : vector<1x4x256xbf16> to vector<4x256xbf16>
    %c7 = arith.constant 7 : index
    %c0_50 = arith.constant 0 : index
    %c0_51 = arith.constant 0 : index
    %60 = vector.load %arg2[%c7, %c0_50, %c0_51] : memref<9x16x4xbf16, #tpu.memory_space<vmem>>, vector<1x16x4xbf16>
    %61 = vector.shape_cast %60 : vector<1x16x4xbf16> to vector<16x4xbf16>
    %cst_52 = arith.constant dense<0.000000e+00> : vector<16x256xf32>
    %62 = tpu.matmul %61, %59, %cst_52 {dimension_numbers = #tpu.dot_dimension_numbers<[1], [0], [0], [1], [0, 0, 1, 1], [], []>} : vector<16x4xbf16>, vector<4x256xbf16>, vector<16x256xf32> -> vector<16x256xf32>
    %63 = arith.addf %57, %62 : vector<16x256xf32>
    %c0_53 = arith.constant 0 : index
    %c0_54 = arith.constant 0 : index
    %c34 = arith.constant 34 : index
    %64 = vector.load %arg1[%c0_53, %c0_54, %c34] : memref<1x4x290xbf16, #tpu.memory_space<vmem>>, vector<1x4x256xbf16>
    %65 = vector.shape_cast %64 : vector<1x4x256xbf16> to vector<4x256xbf16>
    %c1_55 = arith.constant 1 : index
    %c0_56 = arith.constant 0 : index
    %66 = vector.load %arg3[%c1_55, %c0_56] : memref<2x256xbf16, #tpu.memory_space<vmem>>, vector<1x256xbf16>
    %67 = vector.broadcast %66 : vector<1x256xbf16> to vector<4x256xbf16>
    %68 = arith.mulf %65, %67 : vector<4x256xbf16>
    %c8 = arith.constant 8 : index
    %c0_57 = arith.constant 0 : index
    %c0_58 = arith.constant 0 : index
    %69 = vector.load %arg2[%c8, %c0_57, %c0_58] : memref<9x16x4xbf16, #tpu.memory_space<vmem>>, vector<1x16x4xbf16>
    %70 = vector.shape_cast %69 : vector<1x16x4xbf16> to vector<16x4xbf16>
    %cst_59 = arith.constant dense<0.000000e+00> : vector<16x256xf32>
    %71 = tpu.matmul %70, %68, %cst_59 {dimension_numbers = #tpu.dot_dimension_numbers<[1], [0], [0], [1], [0, 0, 1, 1], [], []>} : vector<16x4xbf16>, vector<4x256xbf16>, vector<16x256xf32> -> vector<16x256xf32>
    %72 = arith.addf %63, %71 : vector<16x256xf32>
    %cst_60 = arith.constant dense<0.000000e+00> : vector<16xf32>
    %73 = vector.multi_reduction <add>, %72, %cst_60 [1] : vector<16x256xf32> to vector<16xf32>
    %74 = vector.shape_cast %73 : vector<16xf32> to vector<16x1xf32>
    %c0_61 = arith.constant 0 : index
    %c0_62 = arith.constant 0 : index
    %c0_63 = arith.constant 0 : index
    %75 = vector.load %arg4[%c0_61, %c0_62, %c0_63] : memref<1x16x1xf32, #tpu.memory_space<vmem>>, vector<1x16x1xf32>
    %76 = vector.shape_cast %75 : vector<1x16x1xf32> to vector<16x1xf32>
    %77 = vector.shape_cast %74 : vector<16x1xf32> to vector<1x16x1xf32>
    tpu.vector_store %arg4[%c0_61, %c0_62, %c0_63], %77 {strides = array<i32>} : memref<1x16x1xf32, #tpu.memory_space<vmem>>, vector<1x16x1xf32>,
    %78 = arith.mulf %72, %72 : vector<16x256xf32>
    %cst_64 = arith.constant dense<0.000000e+00> : vector<16xf32>
    %79 = vector.multi_reduction <add>, %78, %cst_64 [1] : vector<16x256xf32> to vector<16xf32>
    %80 = vector.shape_cast %79 : vector<16xf32> to vector<16x1xf32>
    %c0_65 = arith.constant 0 : index
    %c0_66 = arith.constant 0 : index
    %c0_67 = arith.constant 0 : index
    %81 = vector.load %arg5[%c0_65, %c0_66, %c0_67] : memref<1x16x1xf32, #tpu.memory_space<vmem>>, vector<1x16x1xf32>
    %82 = vector.shape_cast %81 : vector<1x16x1xf32> to vector<16x1xf32>
    %83 = vector.shape_cast %80 : vector<16x1xf32> to vector<1x16x1xf32>
    tpu.vector_store %arg5[%c0_65, %c0_66, %c0_67], %83 {strides = array<i32>} : memref<1x16x1xf32, #tpu.memory_space<vmem>>, vector<1x16x1xf32>,
    return
  }
  func.func @transform_0(%arg0: i32) -> (i32, i32, i32) {
    %c0_i32 = arith.constant 0 : i32
    %c0_i32_0 = arith.constant 0 : i32
    %c0_i32_1 = arith.constant 0 : i32
    return %arg0, %c0_i32, %c0_i32_0 : i32, i32, i32
  }
  func.func @transform_1(%arg0: i32) -> (i32, i32, i32) {
    %c0_i32 = arith.constant 0 : i32
    %c0_i32_0 = arith.constant 0 : i32
    %c0_i32_1 = arith.constant 0 : i32
    %c0_i32_2 = arith.constant 0 : i32
    return %c0_i32, %c0_i32_0, %c0_i32_1 : i32, i32, i32
  }
  func.func @transform_2(%arg0: i32) -> (i32, i32) {
    %c0_i32 = arith.constant 0 : i32
    %c0_i32_0 = arith.constant 0 : i32
    %c0_i32_1 = arith.constant 0 : i32
    return %c0_i32, %c0_i32_0 : i32, i32
  }
  func.func @transform_3(%arg0: i32) -> (i32, i32, i32) {
    %c0_i32 = arith.constant 0 : i32
    %c0_i32_0 = arith.constant 0 : i32
    %c0_i32_1 = arith.constant 0 : i32
    return %arg0, %c0_i32, %c0_i32_0 : i32, i32, i32
  }
  func.func @transform_4(%arg0: i32) -> (i32, i32, i32) {
    %c0_i32 = arith.constant 0 : i32
    %c0_i32_0 = arith.constant 0 : i32
    %c0_i32_1 = arith.constant 0 : i32
    return %arg0, %c0_i32, %c0_i32_0 : i32, i32, i32
  }
}

module attributes {stable_mosaic.version = 11 : i64} {
  func.func @_stem_fused_kernel(%arg0: i32, %arg1: memref<1x4x290xbf16, #tpu.memory_space<vmem>>, %arg2: memref<9x16x4xbf16, #tpu.memory_space<vmem>>, %arg3: memref<9x8x8xbf16, #tpu.memory_space<vmem>>, %arg4: memref<2x256xbf16, #tpu.memory_space<vmem>>, %arg5: memref<8x4xf32, #tpu.memory_space<vmem>>, %arg6: memref<1x8x256xf32, #tpu.memory_space<vmem>>, %arg7: memref<8x290xbf16, #tpu.memory_space<vmem>>) attributes {dimension_semantics = [#tpu.dimension_semantics<parallel>], iteration_bounds = array<i64: 2>, scalar_prefetch = 0 : i64, scratch_operands = 1 : i64, tpu.core_type = #tpu.core_type<tc>, window_params = [{transform_indices = @transform_0, window_bounds = array<i64: 1, 4, 290>}, {pipeline_mode = #tpu.pipeline_mode<synchronous>, transform_indices = @transform_1, window_bounds = array<i64: 9, 16, 4>}, {pipeline_mode = #tpu.pipeline_mode<synchronous>, transform_indices = @transform_2, window_bounds = array<i64: 9, 8, 8>}, {pipeline_mode = #tpu.pipeline_mode<synchronous>, transform_indices = @transform_3, window_bounds = array<i64: 2, 256>}, {pipeline_mode = #tpu.pipeline_mode<synchronous>, transform_indices = @transform_4, window_bounds = array<i64: 8, 4>}, {transform_indices = @transform_5, window_bounds = array<i64: 1, 8, 256>}]} {
    %cst = arith.constant 0.000000e+00 : f32
    %0 = vector.broadcast %cst : f32 to vector<16x256xf32>
    %c0 = arith.constant 0 : index
    %c0_0 = arith.constant 0 : index
    %c0_1 = arith.constant 0 : index
    %1 = vector.load %arg1[%c0, %c0_0, %c0_1] : memref<1x4x290xbf16, #tpu.memory_space<vmem>>, vector<1x4x256xbf16>
    %2 = vector.shape_cast %1 : vector<1x4x256xbf16> to vector<4x256xbf16>
    %c0_2 = arith.constant 0 : index
    %c0_3 = arith.constant 0 : index
    %3 = vector.load %arg4[%c0_2, %c0_3] : memref<2x256xbf16, #tpu.memory_space<vmem>>, vector<1x256xbf16>
    %4 = vector.broadcast %3 : vector<1x256xbf16> to vector<4x256xbf16>
    %5 = arith.mulf %2, %4 : vector<4x256xbf16>
    %c0_4 = arith.constant 0 : index
    %c0_5 = arith.constant 0 : index
    %c0_6 = arith.constant 0 : index
    %6 = vector.load %arg2[%c0_4, %c0_5, %c0_6] : memref<9x16x4xbf16, #tpu.memory_space<vmem>>, vector<1x16x4xbf16>
    %7 = vector.shape_cast %6 : vector<1x16x4xbf16> to vector<16x4xbf16>
    %cst_7 = arith.constant dense<0.000000e+00> : vector<16x256xf32>
    %8 = tpu.matmul %7, %5, %cst_7 {dimension_numbers = #tpu.dot_dimension_numbers<[1], [0], [0], [1], [0, 0, 1, 1], [], []>} : vector<16x4xbf16>, vector<4x256xbf16>, vector<16x256xf32> -> vector<16x256xf32>
    %9 = arith.addf %0, %8 : vector<16x256xf32>
    %c0_8 = arith.constant 0 : index
    %c0_9 = arith.constant 0 : index
    %c1 = arith.constant 1 : index
    %10 = vector.load %arg1[%c0_8, %c0_9, %c1] : memref<1x4x290xbf16, #tpu.memory_space<vmem>>, vector<1x4x256xbf16>
    %11 = vector.shape_cast %10 : vector<1x4x256xbf16> to vector<4x256xbf16>
    %c1_10 = arith.constant 1 : index
    %c0_11 = arith.constant 0 : index
    %c0_12 = arith.constant 0 : index
    %12 = vector.load %arg2[%c1_10, %c0_11, %c0_12] : memref<9x16x4xbf16, #tpu.memory_space<vmem>>, vector<1x16x4xbf16>
    %13 = vector.shape_cast %12 : vector<1x16x4xbf16> to vector<16x4xbf16>
    %cst_13 = arith.constant dense<0.000000e+00> : vector<16x256xf32>
    %14 = tpu.matmul %13, %11, %cst_13 {dimension_numbers = #tpu.dot_dimension_numbers<[1], [0], [0], [1], [0, 0, 1, 1], [], []>} : vector<16x4xbf16>, vector<4x256xbf16>, vector<16x256xf32> -> vector<16x256xf32>
    %15 = arith.addf %9, %14 : vector<16x256xf32>
    %c0_14 = arith.constant 0 : index
    %c0_15 = arith.constant 0 : index
    %c2 = arith.constant 2 : index
    %16 = vector.load %arg1[%c0_14, %c0_15, %c2] : memref<1x4x290xbf16, #tpu.memory_space<vmem>>, vector<1x4x256xbf16>
    %17 = vector.shape_cast %16 : vector<1x4x256xbf16> to vector<4x256xbf16>
    %c1_16 = arith.constant 1 : index
    %c0_17 = arith.constant 0 : index
    %18 = vector.load %arg4[%c1_16, %c0_17] : memref<2x256xbf16, #tpu.memory_space<vmem>>, vector<1x256xbf16>
    %19 = vector.broadcast %18 : vector<1x256xbf16> to vector<4x256xbf16>
    %20 = arith.mulf %17, %19 : vector<4x256xbf16>
    %c2_18 = arith.constant 2 : index
    %c0_19 = arith.constant 0 : index
    %c0_20 = arith.constant 0 : index
    %21 = vector.load %arg2[%c2_18, %c0_19, %c0_20] : memref<9x16x4xbf16, #tpu.memory_space<vmem>>, vector<1x16x4xbf16>
    %22 = vector.shape_cast %21 : vector<1x16x4xbf16> to vector<16x4xbf16>
    %cst_21 = arith.constant dense<0.000000e+00> : vector<16x256xf32>
    %23 = tpu.matmul %22, %20, %cst_21 {dimension_numbers = #tpu.dot_dimension_numbers<[1], [0], [0], [1], [0, 0, 1, 1], [], []>} : vector<16x4xbf16>, vector<4x256xbf16>, vector<16x256xf32> -> vector<16x256xf32>
    %24 = arith.addf %15, %23 : vector<16x256xf32>
    %c0_22 = arith.constant 0 : index
    %c0_23 = arith.constant 0 : index
    %c16 = arith.constant 16 : index
    %25 = vector.load %arg1[%c0_22, %c0_23, %c16] : memref<1x4x290xbf16, #tpu.memory_space<vmem>>, vector<1x4x256xbf16>
    %26 = vector.shape_cast %25 : vector<1x4x256xbf16> to vector<4x256xbf16>
    %c0_24 = arith.constant 0 : index
    %c0_25 = arith.constant 0 : index
    %27 = vector.load %arg4[%c0_24, %c0_25] : memref<2x256xbf16, #tpu.memory_space<vmem>>, vector<1x256xbf16>
    %28 = vector.broadcast %27 : vector<1x256xbf16> to vector<4x256xbf16>
    %29 = arith.mulf %26, %28 : vector<4x256xbf16>
    %c3 = arith.constant 3 : index
    %c0_26 = arith.constant 0 : index
    %c0_27 = arith.constant 0 : index
    %30 = vector.load %arg2[%c3, %c0_26, %c0_27] : memref<9x16x4xbf16, #tpu.memory_space<vmem>>, vector<1x16x4xbf16>
    %31 = vector.shape_cast %30 : vector<1x16x4xbf16> to vector<16x4xbf16>
    %cst_28 = arith.constant dense<0.000000e+00> : vector<16x256xf32>
    %32 = tpu.matmul %31, %29, %cst_28 {dimension_numbers = #tpu.dot_dimension_numbers<[1], [0], [0], [1], [0, 0, 1, 1], [], []>} : vector<16x4xbf16>, vector<4x256xbf16>, vector<16x256xf32> -> vector<16x256xf32>
    %33 = arith.addf %24, %32 : vector<16x256xf32>
    %c0_29 = arith.constant 0 : index
    %c0_30 = arith.constant 0 : index
    %c17 = arith.constant 17 : index
    %34 = vector.load %arg1[%c0_29, %c0_30, %c17] : memref<1x4x290xbf16, #tpu.memory_space<vmem>>, vector<1x4x256xbf16>
    %35 = vector.shape_cast %34 : vector<1x4x256xbf16> to vector<4x256xbf16>
    %c4 = arith.constant 4 : index
    %c0_31 = arith.constant 0 : index
    %c0_32 = arith.constant 0 : index
    %36 = vector.load %arg2[%c4, %c0_31, %c0_32] : memref<9x16x4xbf16, #tpu.memory_space<vmem>>, vector<1x16x4xbf16>
    %37 = vector.shape_cast %36 : vector<1x16x4xbf16> to vector<16x4xbf16>
    %cst_33 = arith.constant dense<0.000000e+00> : vector<16x256xf32>
    %38 = tpu.matmul %37, %35, %cst_33 {dimension_numbers = #tpu.dot_dimension_numbers<[1], [0], [0], [1], [0, 0, 1, 1], [], []>} : vector<16x4xbf16>, vector<4x256xbf16>, vector<16x256xf32> -> vector<16x256xf32>
    %39 = arith.addf %33, %38 : vector<16x256xf32>
    %c0_34 = arith.constant 0 : index
    %c0_35 = arith.constant 0 : index
    %c18 = arith.constant 18 : index
    %40 = vector.load %arg1[%c0_34, %c0_35, %c18] : memref<1x4x290xbf16, #tpu.memory_space<vmem>>, vector<1x4x256xbf16>
    %41 = vector.shape_cast %40 : vector<1x4x256xbf16> to vector<4x256xbf16>
    %c1_36 = arith.constant 1 : index
    %c0_37 = arith.constant 0 : index
    %42 = vector.load %arg4[%c1_36, %c0_37] : memref<2x256xbf16, #tpu.memory_space<vmem>>, vector<1x256xbf16>
    %43 = vector.broadcast %42 : vector<1x256xbf16> to vector<4x256xbf16>
    %44 = arith.mulf %41, %43 : vector<4x256xbf16>
    %c5 = arith.constant 5 : index
    %c0_38 = arith.constant 0 : index
    %c0_39 = arith.constant 0 : index
    %45 = vector.load %arg2[%c5, %c0_38, %c0_39] : memref<9x16x4xbf16, #tpu.memory_space<vmem>>, vector<1x16x4xbf16>
    %46 = vector.shape_cast %45 : vector<1x16x4xbf16> to vector<16x4xbf16>
    %cst_40 = arith.constant dense<0.000000e+00> : vector<16x256xf32>
    %47 = tpu.matmul %46, %44, %cst_40 {dimension_numbers = #tpu.dot_dimension_numbers<[1], [0], [0], [1], [0, 0, 1, 1], [], []>} : vector<16x4xbf16>, vector<4x256xbf16>, vector<16x256xf32> -> vector<16x256xf32>
    %48 = arith.addf %39, %47 : vector<16x256xf32>
    %c0_41 = arith.constant 0 : index
    %c0_42 = arith.constant 0 : index
    %c32 = arith.constant 32 : index
    %49 = vector.load %arg1[%c0_41, %c0_42, %c32] : memref<1x4x290xbf16, #tpu.memory_space<vmem>>, vector<1x4x256xbf16>
    %50 = vector.shape_cast %49 : vector<1x4x256xbf16> to vector<4x256xbf16>
    %c0_43 = arith.constant 0 : index
    %c0_44 = arith.constant 0 : index
    %51 = vector.load %arg4[%c0_43, %c0_44] : memref<2x256xbf16, #tpu.memory_space<vmem>>, vector<1x256xbf16>
    %52 = vector.broadcast %51 : vector<1x256xbf16> to vector<4x256xbf16>
    %53 = arith.mulf %50, %52 : vector<4x256xbf16>
    %c6 = arith.constant 6 : index
    %c0_45 = arith.constant 0 : index
    %c0_46 = arith.constant 0 : index
    %54 = vector.load %arg2[%c6, %c0_45, %c0_46] : memref<9x16x4xbf16, #tpu.memory_space<vmem>>, vector<1x16x4xbf16>
    %55 = vector.shape_cast %54 : vector<1x16x4xbf16> to vector<16x4xbf16>
    %cst_47 = arith.constant dense<0.000000e+00> : vector<16x256xf32>
    %56 = tpu.matmul %55, %53, %cst_47 {dimension_numbers = #tpu.dot_dimension_numbers<[1], [0], [0], [1], [0, 0, 1, 1], [], []>} : vector<16x4xbf16>, vector<4x256xbf16>, vector<16x256xf32> -> vector<16x256xf32>
    %57 = arith.addf %48, %56 : vector<16x256xf32>
    %c0_48 = arith.constant 0 : index
    %c0_49 = arith.constant 0 : index
    %c33 = arith.constant 33 : index
    %58 = vector.load %arg1[%c0_48, %c0_49, %c33] : memref<1x4x290xbf16, #tpu.memory_space<vmem>>, vector<1x4x256xbf16>
    %59 = vector.shape_cast %58 : vector<1x4x256xbf16> to vector<4x256xbf16>
    %c7 = arith.constant 7 : index
    %c0_50 = arith.constant 0 : index
    %c0_51 = arith.constant 0 : index
    %60 = vector.load %arg2[%c7, %c0_50, %c0_51] : memref<9x16x4xbf16, #tpu.memory_space<vmem>>, vector<1x16x4xbf16>
    %61 = vector.shape_cast %60 : vector<1x16x4xbf16> to vector<16x4xbf16>
    %cst_52 = arith.constant dense<0.000000e+00> : vector<16x256xf32>
    %62 = tpu.matmul %61, %59, %cst_52 {dimension_numbers = #tpu.dot_dimension_numbers<[1], [0], [0], [1], [0, 0, 1, 1], [], []>} : vector<16x4xbf16>, vector<4x256xbf16>, vector<16x256xf32> -> vector<16x256xf32>
    %63 = arith.addf %57, %62 : vector<16x256xf32>
    %c0_53 = arith.constant 0 : index
    %c0_54 = arith.constant 0 : index
    %c34 = arith.constant 34 : index
    %64 = vector.load %arg1[%c0_53, %c0_54, %c34] : memref<1x4x290xbf16, #tpu.memory_space<vmem>>, vector<1x4x256xbf16>
    %65 = vector.shape_cast %64 : vector<1x4x256xbf16> to vector<4x256xbf16>
    %c1_55 = arith.constant 1 : index
    %c0_56 = arith.constant 0 : index
    %66 = vector.load %arg4[%c1_55, %c0_56] : memref<2x256xbf16, #tpu.memory_space<vmem>>, vector<1x256xbf16>
    %67 = vector.broadcast %66 : vector<1x256xbf16> to vector<4x256xbf16>
    %68 = arith.mulf %65, %67 : vector<4x256xbf16>
    %c8 = arith.constant 8 : index
    %c0_57 = arith.constant 0 : index
    %c0_58 = arith.constant 0 : index
    %69 = vector.load %arg2[%c8, %c0_57, %c0_58] : memref<9x16x4xbf16, #tpu.memory_space<vmem>>, vector<1x16x4xbf16>
    %70 = vector.shape_cast %69 : vector<1x16x4xbf16> to vector<16x4xbf16>
    %cst_59 = arith.constant dense<0.000000e+00> : vector<16x256xf32>
    %71 = tpu.matmul %70, %68, %cst_59 {dimension_numbers = #tpu.dot_dimension_numbers<[1], [0], [0], [1], [0, 0, 1, 1], [], []>} : vector<16x4xbf16>, vector<4x256xbf16>, vector<16x256xf32> -> vector<16x256xf32>
    %72 = arith.addf %63, %71 : vector<16x256xf32>
    %73 = vector.extract_strided_slice %72 {offsets = [0, 0], sizes = [8, 256], strides = [1, 1]} : vector<16x256xf32> to vector<8x256xf32>
    %74 = vector.extract_strided_slice %72 {offsets = [8, 0], sizes = [8, 256], strides = [1, 1]} : vector<16x256xf32> to vector<8x256xf32>
    %c0_60 = arith.constant 0 : index
    %c0_61 = arith.constant 0 : index
    %75 = vector.load %arg5[%c0_60, %c0_61] : memref<8x4xf32, #tpu.memory_space<vmem>>, vector<8x1xf32>
    %76 = vector.broadcast %75 : vector<8x1xf32> to vector<8x256xf32>
    %77 = arith.mulf %73, %76 : vector<8x256xf32>
    %c0_62 = arith.constant 0 : index
    %c1_63 = arith.constant 1 : index
    %78 = vector.load %arg5[%c0_62, %c1_63] : memref<8x4xf32, #tpu.memory_space<vmem>>, vector<8x1xf32>
    %79 = vector.broadcast %78 : vector<8x1xf32> to vector<8x256xf32>
    %80 = arith.addf %77, %79 : vector<8x256xf32>
    %cst_64 = arith.constant 0.000000e+00 : f32
    %81 = vector.broadcast %cst_64 : f32 to vector<8x256xf32>
    %82 = arith.maximumf %80, %81 : vector<8x256xf32>
    %cst_65 = arith.constant 0.000000e+00 : bf16
    %83 = vector.broadcast %cst_65 : bf16 to vector<8x17xbf16>
    %c0_66 = arith.constant 0 : index
    %c0_67 = arith.constant 0 : index
    %84 = vector.load %arg7[%c0_66, %c0_67] : memref<8x290xbf16, #tpu.memory_space<vmem>>, vector<8x17xbf16>
    tpu.vector_store %arg7[%c0_66, %c0_67], %83 {strides = array<i32>} : memref<8x290xbf16, #tpu.memory_space<vmem>>, vector<8x17xbf16>,
    %cst_68 = arith.constant 0.000000e+00 : bf16
    %85 = vector.broadcast %cst_68 : bf16 to vector<8x17xbf16>
    %c0_69 = arith.constant 0 : index
    %c273 = arith.constant 273 : index
    %86 = vector.load %arg7[%c0_69, %c273] : memref<8x290xbf16, #tpu.memory_space<vmem>>, vector<8x17xbf16>
    tpu.vector_store %arg7[%c0_69, %c273], %85 {strides = array<i32>} : memref<8x290xbf16, #tpu.memory_space<vmem>>, vector<8x17xbf16>,
    %87 = arith.truncf %82 : vector<8x256xf32> to vector<8x256xbf16>
    %c0_70 = arith.constant 0 : index
    %c17_71 = arith.constant 17 : index
    %88 = vector.load %arg7[%c0_70, %c17_71] : memref<8x290xbf16, #tpu.memory_space<vmem>>, vector<8x256xbf16>
    tpu.vector_store %arg7[%c0_70, %c17_71], %87 {strides = array<i32>} : memref<8x290xbf16, #tpu.memory_space<vmem>>, vector<8x256xbf16>,
    %cst_72 = arith.constant 0.000000e+00 : f32
    %89 = vector.broadcast %cst_72 : f32 to vector<8x256xf32>
    %c0_73 = arith.constant 0 : index
    %c0_74 = arith.constant 0 : index
    %90 = vector.load %arg7[%c0_73, %c0_74] : memref<8x290xbf16, #tpu.memory_space<vmem>>, vector<8x256xbf16>
    %c0_75 = arith.constant 0 : index
    %c0_76 = arith.constant 0 : index
    %91 = vector.load %arg4[%c0_75, %c0_76] : memref<2x256xbf16, #tpu.memory_space<vmem>>, vector<1x256xbf16>
    %92 = vector.broadcast %91 : vector<1x256xbf16> to vector<8x256xbf16>
    %93 = arith.mulf %90, %92 : vector<8x256xbf16>
    %c0_77 = arith.constant 0 : index
    %c0_78 = arith.constant 0 : index
    %c0_79 = arith.constant 0 : index
    %94 = vector.load %arg3[%c0_77, %c0_78, %c0_79] : memref<9x8x8xbf16, #tpu.memory_space<vmem>>, vector<1x8x8xbf16>
    %95 = vector.shape_cast %94 : vector<1x8x8xbf16> to vector<8x8xbf16>
    %cst_80 = arith.constant dense<0.000000e+00> : vector<8x256xf32>
    %96 = tpu.matmul %95, %93, %cst_80 {dimension_numbers = #tpu.dot_dimension_numbers<[1], [0], [0], [1], [0, 0, 1, 1], [], []>} : vector<8x8xbf16>, vector<8x256xbf16>, vector<8x256xf32> -> vector<8x256xf32>
    %97 = arith.addf %89, %96 : vector<8x256xf32>
    %c0_81 = arith.constant 0 : index
    %c1_82 = arith.constant 1 : index
    %98 = vector.load %arg7[%c0_81, %c1_82] : memref<8x290xbf16, #tpu.memory_space<vmem>>, vector<8x256xbf16>
    %c1_83 = arith.constant 1 : index
    %c0_84 = arith.constant 0 : index
    %c0_85 = arith.constant 0 : index
    %99 = vector.load %arg3[%c1_83, %c0_84, %c0_85] : memref<9x8x8xbf16, #tpu.memory_space<vmem>>, vector<1x8x8xbf16>
    %100 = vector.shape_cast %99 : vector<1x8x8xbf16> to vector<8x8xbf16>
    %cst_86 = arith.constant dense<0.000000e+00> : vector<8x256xf32>
    %101 = tpu.matmul %100, %98, %cst_86 {dimension_numbers = #tpu.dot_dimension_numbers<[1], [0], [0], [1], [0, 0, 1, 1], [], []>} : vector<8x8xbf16>, vector<8x256xbf16>, vector<8x256xf32> -> vector<8x256xf32>
    %102 = arith.addf %97, %101 : vector<8x256xf32>
    %c0_87 = arith.constant 0 : index
    %c2_88 = arith.constant 2 : index
    %103 = vector.load %arg7[%c0_87, %c2_88] : memref<8x290xbf16, #tpu.memory_space<vmem>>, vector<8x256xbf16>
    %c1_89 = arith.constant 1 : index
    %c0_90 = arith.constant 0 : index
    %104 = vector.load %arg4[%c1_89, %c0_90] : memref<2x256xbf16, #tpu.memory_space<vmem>>, vector<1x256xbf16>
    %105 = vector.broadcast %104 : vector<1x256xbf16> to vector<8x256xbf16>
    %106 = arith.mulf %103, %105 : vector<8x256xbf16>
    %c2_91 = arith.constant 2 : index
    %c0_92 = arith.constant 0 : index
    %c0_93 = arith.constant 0 : index
    %107 = vector.load %arg3[%c2_91, %c0_92, %c0_93] : memref<9x8x8xbf16, #tpu.memory_space<vmem>>, vector<1x8x8xbf16>
    %108 = vector.shape_cast %107 : vector<1x8x8xbf16> to vector<8x8xbf16>
    %cst_94 = arith.constant dense<0.000000e+00> : vector<8x256xf32>
    %109 = tpu.matmul %108, %106, %cst_94 {dimension_numbers = #tpu.dot_dimension_numbers<[1], [0], [0], [1], [0, 0, 1, 1], [], []>} : vector<8x8xbf16>, vector<8x256xbf16>, vector<8x256xf32> -> vector<8x256xf32>
    %110 = arith.addf %102, %109 : vector<8x256xf32>
    %c0_95 = arith.constant 0 : index
    %c16_96 = arith.constant 16 : index
    %111 = vector.load %arg7[%c0_95, %c16_96] : memref<8x290xbf16, #tpu.memory_space<vmem>>, vector<8x256xbf16>
    %c0_97 = arith.constant 0 : index
    %c0_98 = arith.constant 0 : index
    %112 = vector.load %arg4[%c0_97, %c0_98] : memref<2x256xbf16, #tpu.memory_space<vmem>>, vector<1x256xbf16>
    %113 = vector.broadcast %112 : vector<1x256xbf16> to vector<8x256xbf16>
    %114 = arith.mulf %111, %113 : vector<8x256xbf16>
    %c3_99 = arith.constant 3 : index
    %c0_100 = arith.constant 0 : index
    %c0_101 = arith.constant 0 : index
    %115 = vector.load %arg3[%c3_99, %c0_100, %c0_101] : memref<9x8x8xbf16, #tpu.memory_space<vmem>>, vector<1x8x8xbf16>
    %116 = vector.shape_cast %115 : vector<1x8x8xbf16> to vector<8x8xbf16>
    %cst_102 = arith.constant dense<0.000000e+00> : vector<8x256xf32>
    %117 = tpu.matmul %116, %114, %cst_102 {dimension_numbers = #tpu.dot_dimension_numbers<[1], [0], [0], [1], [0, 0, 1, 1], [], []>} : vector<8x8xbf16>, vector<8x256xbf16>, vector<8x256xf32> -> vector<8x256xf32>
    %118 = arith.addf %110, %117 : vector<8x256xf32>
    %c0_103 = arith.constant 0 : index
    %c17_104 = arith.constant 17 : index
    %119 = vector.load %arg7[%c0_103, %c17_104] : memref<8x290xbf16, #tpu.memory_space<vmem>>, vector<8x256xbf16>
    %c4_105 = arith.constant 4 : index
    %c0_106 = arith.constant 0 : index
    %c0_107 = arith.constant 0 : index
    %120 = vector.load %arg3[%c4_105, %c0_106, %c0_107] : memref<9x8x8xbf16, #tpu.memory_space<vmem>>, vector<1x8x8xbf16>
    %121 = vector.shape_cast %120 : vector<1x8x8xbf16> to vector<8x8xbf16>
    %cst_108 = arith.constant dense<0.000000e+00> : vector<8x256xf32>
    %122 = tpu.matmul %121, %119, %cst_108 {dimension_numbers = #tpu.dot_dimension_numbers<[1], [0], [0], [1], [0, 0, 1, 1], [], []>} : vector<8x8xbf16>, vector<8x256xbf16>, vector<8x256xf32> -> vector<8x256xf32>
    %123 = arith.addf %118, %122 : vector<8x256xf32>
    %c0_109 = arith.constant 0 : index
    %c18_110 = arith.constant 18 : index
    %124 = vector.load %arg7[%c0_109, %c18_110] : memref<8x290xbf16, #tpu.memory_space<vmem>>, vector<8x256xbf16>
    %c1_111 = arith.constant 1 : index
    %c0_112 = arith.constant 0 : index
    %125 = vector.load %arg4[%c1_111, %c0_112] : memref<2x256xbf16, #tpu.memory_space<vmem>>, vector<1x256xbf16>
    %126 = vector.broadcast %125 : vector<1x256xbf16> to vector<8x256xbf16>
    %127 = arith.mulf %124, %126 : vector<8x256xbf16>
    %c5_113 = arith.constant 5 : index
    %c0_114 = arith.constant 0 : index
    %c0_115 = arith.constant 0 : index
    %128 = vector.load %arg3[%c5_113, %c0_114, %c0_115] : memref<9x8x8xbf16, #tpu.memory_space<vmem>>, vector<1x8x8xbf16>
    %129 = vector.shape_cast %128 : vector<1x8x8xbf16> to vector<8x8xbf16>
    %cst_116 = arith.constant dense<0.000000e+00> : vector<8x256xf32>
    %130 = tpu.matmul %129, %127, %cst_116 {dimension_numbers = #tpu.dot_dimension_numbers<[1], [0], [0], [1], [0, 0, 1, 1], [], []>} : vector<8x8xbf16>, vector<8x256xbf16>, vector<8x256xf32> -> vector<8x256xf32>
    %131 = arith.addf %123, %130 : vector<8x256xf32>
    %c0_117 = arith.constant 0 : index
    %c32_118 = arith.constant 32 : index
    %132 = vector.load %arg7[%c0_117, %c32_118] : memref<8x290xbf16, #tpu.memory_space<vmem>>, vector<8x256xbf16>
    %c0_119 = arith.constant 0 : index
    %c0_120 = arith.constant 0 : index
    %133 = vector.load %arg4[%c0_119, %c0_120] : memref<2x256xbf16, #tpu.memory_space<vmem>>, vector<1x256xbf16>
    %134 = vector.broadcast %133 : vector<1x256xbf16> to vector<8x256xbf16>
    %135 = arith.mulf %132, %134 : vector<8x256xbf16>
    %c6_121 = arith.constant 6 : index
    %c0_122 = arith.constant 0 : index
    %c0_123 = arith.constant 0 : index
    %136 = vector.load %arg3[%c6_121, %c0_122, %c0_123] : memref<9x8x8xbf16, #tpu.memory_space<vmem>>, vector<1x8x8xbf16>
    %137 = vector.shape_cast %136 : vector<1x8x8xbf16> to vector<8x8xbf16>
    %cst_124 = arith.constant dense<0.000000e+00> : vector<8x256xf32>
    %138 = tpu.matmul %137, %135, %cst_124 {dimension_numbers = #tpu.dot_dimension_numbers<[1], [0], [0], [1], [0, 0, 1, 1], [], []>} : vector<8x8xbf16>, vector<8x256xbf16>, vector<8x256xf32> -> vector<8x256xf32>
    %139 = arith.addf %131, %138 : vector<8x256xf32>
    %c0_125 = arith.constant 0 : index
    %c33_126 = arith.constant 33 : index
    %140 = vector.load %arg7[%c0_125, %c33_126] : memref<8x290xbf16, #tpu.memory_space<vmem>>, vector<8x256xbf16>
    %c7_127 = arith.constant 7 : index
    %c0_128 = arith.constant 0 : index
    %c0_129 = arith.constant 0 : index
    %141 = vector.load %arg3[%c7_127, %c0_128, %c0_129] : memref<9x8x8xbf16, #tpu.memory_space<vmem>>, vector<1x8x8xbf16>
    %142 = vector.shape_cast %141 : vector<1x8x8xbf16> to vector<8x8xbf16>
    %cst_130 = arith.constant dense<0.000000e+00> : vector<8x256xf32>
    %143 = tpu.matmul %142, %140, %cst_130 {dimension_numbers = #tpu.dot_dimension_numbers<[1], [0], [0], [1], [0, 0, 1, 1], [], []>} : vector<8x8xbf16>, vector<8x256xbf16>, vector<8x256xf32> -> vector<8x256xf32>
    %144 = arith.addf %139, %143 : vector<8x256xf32>
    %c0_131 = arith.constant 0 : index
    %c34_132 = arith.constant 34 : index
    %145 = vector.load %arg7[%c0_131, %c34_132] : memref<8x290xbf16, #tpu.memory_space<vmem>>, vector<8x256xbf16>
    %c1_133 = arith.constant 1 : index
    %c0_134 = arith.constant 0 : index
    %146 = vector.load %arg4[%c1_133, %c0_134] : memref<2x256xbf16, #tpu.memory_space<vmem>>, vector<1x256xbf16>
    %147 = vector.broadcast %146 : vector<1x256xbf16> to vector<8x256xbf16>
    %148 = arith.mulf %145, %147 : vector<8x256xbf16>
    %c8_135 = arith.constant 8 : index
    %c0_136 = arith.constant 0 : index
    %c0_137 = arith.constant 0 : index
    %149 = vector.load %arg3[%c8_135, %c0_136, %c0_137] : memref<9x8x8xbf16, #tpu.memory_space<vmem>>, vector<1x8x8xbf16>
    %150 = vector.shape_cast %149 : vector<1x8x8xbf16> to vector<8x8xbf16>
    %cst_138 = arith.constant dense<0.000000e+00> : vector<8x256xf32>
    %151 = tpu.matmul %150, %148, %cst_138 {dimension_numbers = #tpu.dot_dimension_numbers<[1], [0], [0], [1], [0, 0, 1, 1], [], []>} : vector<8x8xbf16>, vector<8x256xbf16>, vector<8x256xf32> -> vector<8x256xf32>
    %152 = arith.addf %144, %151 : vector<8x256xf32>
    %c0_139 = arith.constant 0 : index
    %c2_140 = arith.constant 2 : index
    %153 = vector.load %arg5[%c0_139, %c2_140] : memref<8x4xf32, #tpu.memory_space<vmem>>, vector<8x1xf32>
    %154 = vector.broadcast %153 : vector<8x1xf32> to vector<8x256xf32>
    %155 = arith.mulf %74, %154 : vector<8x256xf32>
    %156 = arith.addf %152, %155 : vector<8x256xf32>
    %c0_141 = arith.constant 0 : index
    %c3_142 = arith.constant 3 : index
    %157 = vector.load %arg5[%c0_141, %c3_142] : memref<8x4xf32, #tpu.memory_space<vmem>>, vector<8x1xf32>
    %158 = vector.broadcast %157 : vector<8x1xf32> to vector<8x256xf32>
    %159 = arith.addf %156, %158 : vector<8x256xf32>
    %c0_143 = arith.constant 0 : index
    %c0_144 = arith.constant 0 : index
    %c0_145 = arith.constant 0 : index
    %160 = vector.load %arg6[%c0_143, %c0_144, %c0_145] : memref<1x8x256xf32, #tpu.memory_space<vmem>>, vector<1x8x256xf32>
    %161 = vector.shape_cast %160 : vector<1x8x256xf32> to vector<8x256xf32>
    %162 = vector.shape_cast %159 : vector<8x256xf32> to vector<1x8x256xf32>
    tpu.vector_store %arg6[%c0_143, %c0_144, %c0_145], %162 {strides = array<i32>} : memref<1x8x256xf32, #tpu.memory_space<vmem>>, vector<1x8x256xf32>,
    return
  }
  func.func @transform_0(%arg0: i32) -> (i32, i32, i32) {
    %c0_i32 = arith.constant 0 : i32
    %c0_i32_0 = arith.constant 0 : i32
    %c0_i32_1 = arith.constant 0 : i32
    return %arg0, %c0_i32, %c0_i32_0 : i32, i32, i32
  }
  func.func @transform_1(%arg0: i32) -> (i32, i32, i32) {
    %c0_i32 = arith.constant 0 : i32
    %c0_i32_0 = arith.constant 0 : i32
    %c0_i32_1 = arith.constant 0 : i32
    %c0_i32_2 = arith.constant 0 : i32
    return %c0_i32, %c0_i32_0, %c0_i32_1 : i32, i32, i32
  }
  func.func @transform_2(%arg0: i32) -> (i32, i32, i32) {
    %c0_i32 = arith.constant 0 : i32
    %c0_i32_0 = arith.constant 0 : i32
    %c0_i32_1 = arith.constant 0 : i32
    %c0_i32_2 = arith.constant 0 : i32
    return %c0_i32, %c0_i32_0, %c0_i32_1 : i32, i32, i32
  }
  func.func @transform_3(%arg0: i32) -> (i32, i32) {
    %c0_i32 = arith.constant 0 : i32
    %c0_i32_0 = arith.constant 0 : i32
    %c0_i32_1 = arith.constant 0 : i32
    return %c0_i32, %c0_i32_0 : i32, i32
  }
  func.func @transform_4(%arg0: i32) -> (i32, i32) {
    %c0_i32 = arith.constant 0 : i32
    %c0_i32_0 = arith.constant 0 : i32
    %c0_i32_1 = arith.constant 0 : i32
    return %c0_i32, %c0_i32_0 : i32, i32
  }
  func.func @transform_5(%arg0: i32) -> (i32, i32, i32) {
    %c0_i32 = arith.constant 0 : i32
    %c0_i32_0 = arith.constant 0 : i32
    %c0_i32_1 = arith.constant 0 : i32
    return %arg0, %c0_i32, %c0_i32_0 : i32, i32, i32
  }
}

</mosaic_0001>

<bundles_post_ra>
// kernel: stem_block_forward.2
= control target key start
LH: loop header
LB: loop body
LE: loop exit
PB: predicated region body
PF: predicated region fallthrough
CT: control target
= control target key end

     0   :  { %s1396_s15 = smov 0   ;;  %s1521_s0 = inlined_call_operand.vmem [shape: bf16[2,4,290], index: 0, kind: input, shape index: {}]   ;;  %s1522_s1 = inlined_call_operand.vmem [shape: bf16[9,16,4], index: 1, kind: input, shape index: {}]   ;;  %s1523_s2 = inlined_call_operand.vmem [shape: bf16[2,256], index: 2, kind: input, shape index: {}]   ;;  %s1524_s3 = inlined_call_operand.vmem [shape: f32[2,16,1], index: 3, kind: output, shape index: {0}]   ;;  %s1525_s4 = inlined_call_operand.vmem [shape: f32[2,16,1], index: 4, kind: output, shape index: {1}]  }
   0x1 LB: > { %s1251_s16 = sadd.s32 4294967295, %s1353_s15   ;;  %p1255_p0 = scmp.ge.s32.totalorder %s1353_s15, 1  ;;  %s1353_s15 = sphi %s1396_s15, %s15_s15  }
   0x2   : > { %p165_p1 = scmp.lt.s32.totalorder %s1353_s15, 3 }
   0x4   : > { %p166_p2 = pnand %p1255_p0, %p165_p1 }
   0x5   : > { %p196_p3 = scmp.lt.s32.totalorder (!%p166_p2), %s1251_s16, 1  ;;  %s1357_s23 = smov (!%p166_p2), 2  }
   0x6   : > { %169 = sbr.rel (%p166_p2) target bundleno = 654 (0x28e), region = 32  ;;  %s1358_s24 = smov (!%p166_p2), 18  }
   0x7   : > { %s1359_s25 = smov (!%p166_p2), 16   ;;  %s1360_s26 = smov (!%p166_p2), 32  }
   0x8   : > { %s1361_s27 = smov (!%p166_p2), 34   ;;  %s1362_s28 = smov (!%p166_p2), 127  }
   0x9   : > { %s1363_s29 = smov (!%p166_p2), 111   ;;  %s1365_s6 = smov (!%p166_p2), 126  }
   0xa   : > { %s1366_s7 = smov (!%p166_p2), 112   ;;  %s1367_s10 = smov (!%p166_p2), 96  }
   0xb   : > { %v226_v0 = vlaneseq  ;;  %v1355_v1 = vmov 1966171168   ;;  %v1270_v3 = vld.sshfl [vmem:[%s1523_s2] sm:$0x11 pattern:$0x75316420] }
   0xc   : > { %v224_v2 = vunpack.c.l.s4 %v1355_v1  ;;  %v430_v6 = vcombine.high %v1270_v3, %v1270_v3  ;;  %v1356_v7 = vmov 1983009808   ;;  %s1527_s16 = smov (!%p196_p3, %s1251_s16), 1  ;;  %vm304_vm0 = vcmask 1041408   ;;  %v1339_v44 = vld [vmem:[%s1522_s1] sm:$0xff]   ;;  %s1368_s11 = smov 110  }
   0xd   : > { %v227_v4 = vshrl.u32 %v226_v0, 7  ;;  %v255_v8 = vunpack.c.l.s4 %v1356_v7  ;;  %s1310_s19 = smul.u32 6, %s1527_s16  ;;  %v1364_v45 = vmov 0   ;;  %vm300_vm1 = vcmask 31744   ;;  %s1369_s12 = smov 95  }
   0xe   : > { %v225_v5 = vunpack.c.0.s8 %v224_v2  ;;  %343 = vmatprep.mubr.bf16.mxu0 %v1364_v45  ;;  %409 = vmatprep.mubr.bf16.mxu1 %v1364_v45  ;;  %vm474_vm2 = vcmask 15360   ;;  %vm572_vm3 = vcmask 130048   ;;  %vm859_vm4 = vcmask 261120   ;;  %s1370_s13 = smov 94   ;;  %s1308_s30 = sshll.u32 %s1527_s16, 4 }
   0xf   : > { %v242_v10 = vsub.s32 0, %v227_v4  ;;  %v256_v13 = vunpack.c.0.s8 %v255_v8  ;;  %s1416_s22 = scalar_lea.vmem %s1521_s0, %s1310_s19  ;;  %vm297_vm5 = vcmask 1039360   ;;  %vm761_vm6 = vcmask 146432  }
  0x10   : > { %v228_v9 = vsub.s32 %v225_v5, %v227_v4  ;;  %v265_v29 = vld [vmem:[%s1416_s22] sm:$0x3f]  ;;  %vm1048_vm7 = vcmask 277504   ;;  %vm607_vm8 = vcmask 916480   ;;  %vm509_vm9 = vcmask 1031168  }
  0x11   : > { %v1409_v22 = vsub.s32 %v256_v13, %v227_v4  ;;  %v275_v31 = vcombine.high %v265_v29, %v265_v29  ;;  %v666_v32 = vld [vmem:[%s1416_s22] sm:$0x3f]  ;;  %vm698_vm10 = vcmask 908288   ;;  %vm894_vm11 = vcmask 785408  }
  0x12   : > { %v437_v11 = vrot.slane %v1270_v3, %v228_v9  ;;  %v444_v12 = vrot.slane %v430_v6, %v228_v9  ;;  %v676_v36 = vcombine.high %v666_v32, %v666_v32  ;;  %v212_v39 = vld [vmem:[%s1416_s22] sm:$0xf]  ;;  %vm796_vm12 = vcmask 900096  }
  0x13   : > { %v282_v30 = vrot.slane %v265_v29, %v1409_v22  ;;  %v289_v34 = vrot.slane %v275_v31, %v1409_v22  ;;  %v683_v35 = vrot.slane %v666_v32, %v1409_v22  ;;  %v420_v48 = vld [vmem:[%s1416_s22] sm:$0x3f]  ;;  %vm985_vm13 = vcmask 777216  }
  0x14   : > { %v446_v14 = vshrl.u32 %v437_v11, 16  ;;  %v454_v15 = vshrl.u32 %v444_v12, 16  ;;  %v238_v16 = vpack.i.b16 %v437_v11, %v437_v11  ;;  %v245_v17 = vpack.i.b16 %v444_v12, %v444_v12  ;;  %v568_v54 = vld [vmem:[%s1416_s22] sm:$0x3f]  ;;  %v1338_v12 = vld [vmem:[%s1522_s1 + $0x8] sm:$0xff]  }
  0x15   : > { %v290_v33 = vcombine.high %v282_v30, %v282_v30  ;;  %v691_v37 = vcombine.high %v683_v35, %v683_v35  ;;  %v690_v38 = vrot.slane %v676_v36, %v1409_v22  ;;  %v855_v1 = vld [vmem:[%s1416_s22] sm:$0x3f]  ;;  %vm1083_vm14 = vcmask 769024  }
  0x16   : > { %v447_v18 = vpack.i.b16 %v446_v14, %v446_v14  ;;  %v455_v19 = vpack.i.b16 %v454_v15, %v454_v15  ;;  %v243_v20 = vrot.slane %v238_v16, %v242_v10  ;;  %v250_v21 = vrot.slane %v245_v17, %v242_v10  ;;  %v757_v13 = vld [vmem:[%s1416_s22] sm:$0x3f] }
  0x17   : > { %vm1148_vm15 = vcmask 7168  }
  0x18   : > { %v452_v23 = vrot.slane %v447_v18, %v242_v10  ;;  %v460_v24 = vrot.slane %v455_v19, %v242_v10  ;;  %v253_v26 = vcombine.low %v243_v20, %v250_v21 }
  0x1a   : > { %v463_v25 = vcombine.low %v452_v23, %v460_v24  ;;  %v260_v28 = vrot.slane %v253_v26, %v1409_v22  ;;  %v953_v23 = vld [vmem:[%s1416_s22] sm:$0x3f] }
  0x1c   : > { %v470_v27 = vrot.slane %v463_v25, %v1409_v22  ;;  %v262_v40 = vmul.bf16 %v260_v28, %v212_v39 }
  0x1e   : > { %471 = vrot.lane.b32.xlu0 %v470_v27, %s1357_s23  ;;  %758 = vrot.lane.b32.xlu1 %v470_v27, %s1358_s24  ;;  %v366_v41 = vrot.slane %v262_v40, %v1409_v22 }
  0x20   : > { %v367_v42 = vcombine.high %v366_v41, %v366_v41  ;;  %v372_v43 = vsel %vm304_vm0, %v366_v41, 0 }
  0x22   : > { %569 = vrot.lane.b32.xlu0 %v260_v28, %s1359_s25  ;;  %856 = vrot.lane.b32.xlu1 %v260_v28, %s1360_s26  ;;  %v1044_v28 = vld [vmem:[%s1416_s22] sm:$0x3f] }
  0x23   : > { %1268 = vmatprep.subr.msk.bf16.mxu1 %vm304_vm0, %v367_v42 }
  0x24   : > { %392 = vmatpush1.bf16.msra.mxu1 %v372_v43 }
  0x26   : > { %1045 = vrot.lane.b32.xlu0 %v470_v27, %s1361_s27  ;;  %291 = vrot.lane.b32.xlu1 %v282_v30, %s1362_s28  ;;  %v970_v27 = vrot.slane %v953_v23, %v1409_v22 }
  0x27   : > { %1269 = vmatmul.mubr.msk.bf16.vlgmr.msra.gmra.mxu1 %vm300_vm1, %v1339_v44 }
  0x28   : > { %651 = vmatprep.mubr.bf16.mxu1 %v1364_v45 }
  0x2a   : > { %293 = vrot.lane.b32.xlu0 %v290_v33, %s1362_s28  ;;  %295 = vrot.lane.b32.xlu1 %v289_v34, %s1362_s28  ;;  %v978_v33 = vcombine.high %v970_v27, %v970_v27  ;;  %v963_v34 = vcombine.high %v953_v23, %v953_v23 }
  0x2e   : > { %692 = vrot.lane.b32.xlu0 %v683_v35, %s1363_s29  ;;  %694 = vrot.lane.b32.xlu1 %v691_v37, %s1363_s29  ;;  %v977_v37 = vrot.slane %v963_v34, %v1409_v22 }
  0x32   : > { %696 = vrot.lane.b32.xlu0 %v690_v38, %s1363_s29 }
  0x90   : > { %v472_v46 = vpop.permute.xlu0 %471  ;;  %v759_v47 = vpop.permute.xlu1 %758 }
  0x91   : > { %v473_v49 = vrot.slane %v472_v46, 6  ;;  %v760_v0 = vrot.slane %v759_v47, 6 }
  0x93   : > { %v475_v50 = vsel %vm474_vm2, %v473_v49, %v472_v46  ;;  %v762_v14 = vsel %vm761_vm6, %v760_v0, %v759_v47 }
  0x94   : > { %v477_v51 = vmul.bf16 %v475_v50, %v420_v48  ;;  %v570_v52 = vpop.permute.xlu0 %569  ;;  %v857_v53 = vpop.permute.xlu1 %856  ;;  %v764_v16 = vmul.bf16 %v762_v14, %v757_v13  ;;  %v1344_v13 = vld [vmem:[%s1522_s1 + $0x30] sm:$0xff]  }
  0x95   : > { %v571_v55 = vrot.slane %v570_v52, 6  ;;  %v858_v58 = vrot.slane %v857_v53, 6 }
  0x96   : > { %v494_v56 = vrot.slane %v477_v51, %v1409_v22  ;;  %v487_v3 = vcombine.high %v477_v51, %v477_v51  ;;  %v781_v20 = vrot.slane %v764_v16, %v1409_v22  ;;  %v774_v25 = vcombine.high %v764_v16, %v764_v16 }
  0x97   : > { %v573_v57 = vsel %vm572_vm3, %v571_v55, %v570_v52  ;;  %v860_v2 = vsel %vm859_vm4, %v858_v58, %v857_v53 }
  0x98   : > { %v575_v59 = vmul.bf16 %v573_v57, %v568_v54  ;;  %503 = vrot.lane.b32.xlu0 %v494_v56, %s1365_s6  ;;  %v1046_v60 = vpop.permute.xlu0 %1045  ;;  %v292_v61 = vpop.permute.xlu1 %291  ;;  %v862_v9 = vmul.bf16 %v860_v2, %v855_v1  ;;  %v501_v15 = vrot.slane %v487_v3, %v1409_v22  ;;  %v502_v17 = vcombine.high %v494_v56, %v494_v56  ;;  %v1340_v57 = vld [vmem:[%s1522_s1 + $0x10] sm:$0xff]   ;;  %v1342_v2 = vld [vmem:[%s1522_s1 + $0x20] sm:$0xff]  }
  0x99   : > { %v1047_v21 = vrot.slane %v1046_v60, 6  ;;  %v789_v30 = vcombine.high %v781_v20, %v781_v20  ;;  %v788_v32 = vrot.slane %v774_v25, %v1409_v22  ;;  %v1346_v25 = vld [vmem:[%s1522_s1 + $0x40] sm:$0xff]  }
  0x9a   : > { %v585_v62 = vcombine.high %v575_v59, %v575_v59  ;;  %v592_v63 = vrot.slane %v575_v59, %v1409_v22  ;;  %v879_v18 = vrot.slane %v862_v9, %v1409_v22  ;;  %v872_v19 = vcombine.high %v862_v9, %v862_v9 }
  0x9b   : > { %v1049_v29 = vsel %vm1048_vm7, %v1047_v21, %v1046_v60 }
  0x9c   : > { %601 = vrot.lane.b32.xlu1 %v592_v63, %s1366_s7  ;;  %v600_v4 = vcombine.high %v592_v63, %v592_v63  ;;  %v294_v5 = vpop.permute.xlu0 %293  ;;  %v296_v6 = vpop.permute.xlu1 %295  ;;  %v599_v10 = vrot.slane %v585_v62, %v1409_v22  ;;  %v886_v24 = vrot.slane %v872_v19, %v1409_v22  ;;  %v887_v26 = vcombine.high %v879_v18, %v879_v18 }
  0x9d   : > { %v299_v7 = vsel %vm297_vm5, %v294_v5, %v296_v6  ;;  %v298_v8 = vsel %vm297_vm5, %v292_v61, %v294_v5  ;;  %v1051_v31 = vmul.bf16 %v1049_v29, %v1044_v28 }
  0x9e   : > { %603 = vrot.lane.b32.xlu0 %v600_v4, %s1366_s7  ;;  %1265 = vmatprep.subr.msk.bf16.mxu0 %vm304_vm0, %v299_v7  ;;  %v306_v11 = vsel %vm304_vm0, %v298_v8, 0 }
  0x9f   : > { %326 = vmatpush1.bf16.msra.mxu0 %v306_v11  ;;  %v1068_v35 = vrot.slane %v1051_v31, %v1409_v22  ;;  %v1061_v36 = vcombine.high %v1051_v31, %v1051_v31 }
  0xa0   : > { %605 = vrot.lane.b32.xlu1 %v599_v10, %s1366_s7  ;;  %v693_v40 = vpop.permute.xlu0 %692  ;;  %v695_v42 = vpop.permute.xlu1 %694  ;;  %v1343_v10 = vld [vmem:[%s1522_s1 + $0x28] sm:$0xff]   ;;  %s205_s7 = scalar_lea.vmem %s1524_s3, %s1308_s30 }
  0xa1   : > { %v1075_v38 = vrot.slane %v1061_v36, %v1409_v22  ;;  %v1076_v39 = vcombine.high %v1068_v35, %v1068_v35  ;;  %v1341_v22 = vld [vmem:[%s1522_s1 + $0x18] sm:$0xff]   ;;  %v699_v58 = vsel %vm698_vm10, %v693_v40, %v695_v42 }
  0xa2   : > { %507 = vrot.lane.b32.xlu0 %v501_v15, %s1365_s6  ;;  %1266 = vmatmul.mubr.msk.bf16.vlgmr.msra.gmra.mxu0 %vm300_vm1, %v1338_v12  ;;  %v705_v61 = vsel %vm304_vm0, %v699_v58, 0 }
  0xa3   : > { %553 = vmatprep.mubr.bf16.mxu0 %v1364_v45 }
  0xa4   : > { %505 = vrot.lane.b32.xlu1 %v502_v17, %s1365_s6  ;;  %v697_v41 = vpop.permute.xlu0 %696 }
  0xa5   : > { %v700_v59 = vsel %vm698_vm10, %v695_v42, %v697_v41 }
  0xa6   : > { %888 = vrot.lane.b32.xlu0 %v879_v18, %s1367_s10  ;;  %v1345_v18 = vld [vmem:[%s1522_s1 + $0x38] sm:$0xff]  }
  0xa8   : > { %790 = vrot.lane.b32.xlu1 %v781_v20, %s1368_s11 }
  0xaa   : > { %892 = vrot.lane.b32.xlu0 %v886_v24, %s1367_s10 }
  0xac   : > { %890 = vrot.lane.b32.xlu1 %v887_v26, %s1367_s10  ;;  %s210_s10 = scalar_lea.vmem %s1525_s4, %s1308_s30 }
  0xae   : > { %792 = vrot.lane.b32.xlu0 %v789_v30, %s1368_s11 }
  0xb0   : > { %794 = vrot.lane.b32.xlu1 %v788_v32, %s1368_s11 }
  0xb2   : > { %981 = vrot.lane.b32.xlu0 %v978_v33, %s1369_s12 }
  0xb4   : > { %979 = vrot.lane.b32.xlu1 %v970_v27, %s1369_s12 }
  0xb6   : > { %1077 = vrot.lane.b32.xlu0 %v1068_v35, %s1370_s13 }
  0xb8   : > { %983 = vrot.lane.b32.xlu1 %v977_v37, %s1369_s12 }
  0xba   : > { %1081 = vrot.lane.b32.xlu0 %v1075_v38, %s1370_s13 }
  0xbc   : > { %1079 = vrot.lane.b32.xlu1 %v1076_v39, %s1370_s13 }
  0xe7   : > { %v411_v26 = vpop.f32.mrf.mxu1 }
 0x10a   : > { %v504_v43 = vpop.permute.xlu0 %503 }
 0x10e   : > { %v602_v44 = vpop.permute.xlu1 %601 }
 0x110   : > { %v604_v46 = vpop.permute.xlu0 %603 }
 0x111   : > { %v608_v47 = vsel %vm607_vm8, %v602_v44, %v604_v46 }
 0x112   : > { %v606_v48 = vpop.permute.xlu1 %605  ;;  %v614_v50 = vsel %vm304_vm0, %v608_v47, 0 }
 0x113   : > { %v609_v49 = vsel %vm607_vm8, %v604_v46, %v606_v48 }
 0x114   : > { %v508_v51 = vpop.permute.xlu0 %507  ;;  %1279 = vmatprep.subr.msk.bf16.mxu1 %vm304_vm0, %v609_v49 }
 0x115   : > { %634 = vmatpush1.bf16.msra.mxu1 %v614_v50 }
 0x116   : > { %v506_v52 = vpop.permute.xlu1 %505 }
 0x117   : > { %v510_v53 = vsel %vm509_vm9, %v504_v43, %v506_v52  ;;  %v511_v54 = vsel %vm509_vm9, %v506_v52, %v508_v51 }
 0x118   : > { %v516_v55 = vsel %vm304_vm0, %v510_v53, 0  ;;  %v889_v56 = vpop.permute.xlu0 %888  ;;  %1274 = vmatprep.subr.msk.bf16.mxu0 %vm304_vm0, %v511_v54  ;;  %1280 = vmatmul.mubr.msk.bf16.vlgmr.msra.gmra.mxu1 %vm300_vm1, %v1341_v22 }
 0x119   : > { %536 = vmatpush1.bf16.msra.mxu0 %v516_v55  ;;  %840 = vmatprep.mubr.bf16.mxu1 %v1364_v45 }
 0x11a   : > { %1284 = vmatprep.subr.msk.bf16.mxu0 %vm304_vm0, %v700_v59  ;;  %v791_v60 = vpop.permute.xlu1 %790 }
 0x11c   : > { %v893_v62 = vpop.permute.xlu0 %892  ;;  %1275 = vmatmul.mubr.msk.bf16.vlgmr.msra.gmra.mxu0 %vm300_vm1, %v1340_v57 }
 0x11d   : > { %725 = vmatpush1.bf16.msra.mxu0 %v705_v61  ;;  %742 = vmatprep.mubr.bf16.mxu0 %v1364_v45 }
 0x11e   : > { %v891_v63 = vpop.permute.xlu1 %890 }
 0x11f   : > { %v896_v0 = vsel %vm894_vm11, %v891_v63, %v893_v62  ;;  %v895_v3 = vsel %vm894_vm11, %v889_v56, %v891_v63 }
 0x120   : > { %v793_v1 = vpop.permute.xlu0 %792  ;;  %1294 = vmatprep.subr.msk.bf16.mxu0 %vm304_vm0, %v896_v0  ;;  %v901_v7 = vsel %vm304_vm0, %v895_v3, 0 }
 0x121   : > { %v797_v4 = vsel %vm796_vm12, %v791_v60, %v793_v1 }
 0x122   : > { %v795_v5 = vpop.permute.xlu1 %794  ;;  %v803_v8 = vsel %vm304_vm0, %v797_v4, 0 }
 0x123   : > { %v798_v6 = vsel %vm796_vm12, %v793_v1, %v795_v5 }
 0x124   : > { %v982_v9 = vpop.permute.xlu0 %981  ;;  %1285 = vmatmul.mubr.msk.bf16.vlgmr.msra.gmra.mxu0 %vm300_vm1, %v1342_v2  ;;  %1289 = vmatprep.subr.msk.bf16.mxu1 %vm304_vm0, %v798_v6 }
 0x125   : > { %921 = vmatpush1.bf16.msra.mxu0 %v901_v7  ;;  %823 = vmatpush1.bf16.msra.mxu1 %v803_v8 }
 0x126   : > { %v980_v11 = vpop.permute.xlu1 %979  ;;  %938 = vmatprep.mubr.bf16.mxu0 %v1364_v45 }
 0x127   : > { %v986_v14 = vsel %vm985_vm13, %v980_v11, %v982_v9 }
 0x128   : > { %v1078_v12 = vpop.permute.xlu0 %1077  ;;  %1290 = vmatmul.mubr.msk.bf16.vlgmr.msra.gmra.mxu1 %vm300_vm1, %v1343_v10  ;;  %v992_v17 = vsel %vm304_vm0, %v986_v14, 0 }
 0x129   : > { %1029 = vmatprep.mubr.bf16.mxu1 %v1364_v45 }
 0x12a   : > { %v984_v15 = vpop.permute.xlu1 %983 }
 0x12b   : > { %v987_v16 = vsel %vm985_vm13, %v982_v9, %v984_v15 }
 0x12c   : > { %1295 = vmatmul.mubr.msk.bf16.vlgmr.msra.gmra.mxu0 %vm300_vm1, %v1344_v13  ;;  %1299 = vmatprep.subr.msk.bf16.mxu1 %vm304_vm0, %v987_v16  ;;  %v1082_v19 = vpop.permute.xlu0 %1081 }
 0x12d   : > { %1012 = vmatpush1.bf16.msra.mxu1 %v992_v17  ;;  %1127 = vmatprep.mubr.bf16.mxu0 %v1364_v45  ;;  %v413_v45 = vpop.f32.mrf.mxu1 }
 0x12e   : > { %v1080_v20 = vpop.permute.xlu1 %1079 }
 0x12f   : > { %v1084_v21 = vsel %vm1083_vm14, %v1078_v12, %v1080_v20  ;;  %v1085_v23 = vsel %vm1083_vm14, %v1080_v20, %v1082_v19  ;;  %v415_v29 = vpop.f32.mrf.mxu1 }
 0x130   : > { %v1090_v24 = vsel %vm304_vm0, %v1084_v21, 0  ;;  %1300 = vmatmul.mubr.msk.bf16.vlgmr.msra.gmra.mxu1 %vm300_vm1, %v1345_v18  ;;  %1304 = vmatprep.subr.msk.bf16.mxu0 %vm304_vm0, %v1085_v23 }
 0x131   : > { %1110 = vmatpush1.bf16.msra.mxu0 %v1090_v24  ;;  %v417_v31 = vpop.f32.mrf.mxu1 }
 0x134   : > { %1305 = vmatmul.mubr.msk.bf16.vlgmr.msra.gmra.mxu0 %vm300_vm1, %v1346_v25 }
 0x162   : > { %v345_v27 = vpop.f32.mrf.mxu0 }
 0x163   : > { %v412_v43 = vadd.f32 %v411_v26, %v345_v27 }
 0x164   : > { %v347_v28 = vpop.f32.mrf.mxu0 }
 0x165   : > { %v414_v44 = vadd.f32 %v413_v45, %v347_v28 }
 0x166   : > { %v349_v30 = vpop.f32.mrf.mxu0 }
 0x167   : > { %v416_v48 = vadd.f32 %v415_v29, %v349_v30 }
 0x168   : > { %v351_v32 = vpop.f32.mrf.mxu0 }
 0x169   : > { %v418_v52 = vadd.f32 %v417_v31, %v351_v32 }
 0x1d8   : > { %v653_v33 = vpop.f32.mrf.mxu1 }
 0x1da   : > { %v655_v36 = vpop.f32.mrf.mxu1 }
 0x1dc   : > { %v555_v34 = vpop.f32.mrf.mxu0  ;;  %v657_v39 = vpop.f32.mrf.mxu1 }
 0x1dd   : > { %v564_v49 = vadd.f32 %v555_v34, %v412_v43 }
 0x1de   : > { %v557_v35 = vpop.f32.mrf.mxu0  ;;  %v659_v41 = vpop.f32.mrf.mxu1 }
 0x1df   : > { %v565_v50 = vadd.f32 %v557_v35, %v414_v44  ;;  %v662_v56 = vadd.f32 %v653_v33, %v564_v49 }
 0x1e0   : > { %v559_v37 = vpop.f32.mrf.mxu0 }
 0x1e1   : > { %v566_v53 = vadd.f32 %v559_v37, %v416_v48  ;;  %v663_v57 = vadd.f32 %v655_v36, %v565_v50 }
 0x1e2   : > { %v561_v38 = vpop.f32.mrf.mxu0 }
 0x1e3   : > { %v567_v58 = vadd.f32 %v561_v38, %v418_v52  ;;  %v664_v61 = vadd.f32 %v657_v39, %v566_v53 }
 0x1e4   : > { %v744_v40 = vpop.f32.mrf.mxu0 }
 0x1e5   : > { %v753_v62 = vadd.f32 %v744_v40, %v662_v56  ;;  %v665_v2 = vadd.f32 %v659_v41, %v567_v58 }
 0x1e6   : > { %v746_v42 = vpop.f32.mrf.mxu0 }
 0x1e7   : > { %v754_v63 = vadd.f32 %v746_v42, %v663_v57 }
 0x1e8   : > { %v748_v46 = vpop.f32.mrf.mxu0  ;;  %v842_v47 = vpop.f32.mrf.mxu1 }
 0x1e9   : > { %v755_v3 = vadd.f32 %v748_v46, %v664_v61  ;;  %v851_v4 = vadd.f32 %v842_v47, %v753_v62 }
 0x1ea   : > { %v750_v51 = vpop.f32.mrf.mxu0  ;;  %v844_v22 = vpop.f32.mrf.mxu1 }
 0x1eb   : > { %v852_v5 = vadd.f32 %v844_v22, %v754_v63  ;;  %v756_v8 = vadd.f32 %v750_v51, %v665_v2 }
 0x1ec   : > { %v846_v54 = vpop.f32.mrf.mxu1  ;;  %v940_v55 = vpop.f32.mrf.mxu0 }
 0x1ed   : > { %v853_v9 = vadd.f32 %v846_v54, %v755_v3  ;;  %v949_v10 = vadd.f32 %v940_v55, %v851_v4 }
 0x1ee   : > { %v848_v59 = vpop.f32.mrf.mxu1  ;;  %v942_v60 = vpop.f32.mrf.mxu0 }
 0x1ef   : > { %v950_v11 = vadd.f32 %v942_v60, %v852_v5  ;;  %v854_v14 = vadd.f32 %v848_v59, %v756_v8 }
 0x1f0   : > { %v944_v0 = vpop.f32.mrf.mxu0  ;;  %v1031_v1 = vpop.f32.mrf.mxu1 }
 0x1f1   : > { %v951_v15 = vadd.f32 %v944_v0, %v853_v9  ;;  %v1040_v16 = vadd.f32 %v1031_v1, %v949_v10 }
 0x1f2   : > { %v946_v6 = vpop.f32.mrf.mxu0  ;;  %v1033_v7 = vpop.f32.mrf.mxu1 }
 0x1f3   : > { %v1041_v17 = vadd.f32 %v1033_v7, %v950_v11  ;;  %v952_v20 = vadd.f32 %v946_v6, %v854_v14 }
 0x1f4   : > { %v1035_v12 = vpop.f32.mrf.mxu1  ;;  %v1129_v13 = vpop.f32.mrf.mxu0 }
 0x1f5   : > { %v1042_v21 = vadd.f32 %v1035_v12, %v951_v15  ;;  %v1138_v23 = vadd.f32 %v1129_v13, %v1040_v16 }
 0x1f6   : > { %v1037_v18 = vpop.f32.mrf.mxu1  ;;  %v1131_v19 = vpop.f32.mrf.mxu0 }
 0x1f7   : > { %v1139_v24 = vadd.f32 %v1131_v19, %v1041_v17  ;;  %v1043_v26 = vadd.f32 %v1037_v18, %v952_v20  ;;  %v1151_v34 = vmul.f32 %v1138_v23, %v1138_v23 }
 0x1f8   : > { %v1133_v25 = vpop.f32.mrf.mxu0 }
 0x1f9   : > { %v1140_v27 = vadd.f32 %v1133_v25, %v1042_v21  ;;  %v1142_v45 = vadd.f32 %v1139_v24, %v1138_v23  ;;  %v1152_v30 = vmul.f32 %v1139_v24, %v1139_v24 }
 0x1fa   : > { %v1135_v28 = vpop.f32.mrf.mxu0 }
 0x1fb   : > { %v1141_v29 = vadd.f32 %v1135_v28, %v1043_v26  ;;  %1143 = vadd.xlane.f32.xlu1 %v1142_v45  ;;  %v1153_v31 = vmul.f32 %v1140_v27, %v1140_v27  ;;  %v1155_v36 = vadd.f32 %v1152_v30, %v1151_v34 }
 0x1fd   : > { %v1154_v32 = vmul.f32 %v1141_v29, %v1141_v29  ;;  %v1145_v33 = vadd.f32 %v1141_v29, %v1140_v27 }
 0x1ff   : > { %1146 = vadd.xlane.f32.xlu0 %v1145_v33  ;;  %v1158_v35 = vadd.f32 %v1154_v32, %v1153_v31 }
 0x201   : > { %1159 = vadd.xlane.f32.xlu1 %v1158_v35 }
 0x203   : > { %1156 = vadd.xlane.f32.xlu0 %v1155_v36 }
 0x284   : > { %v1144_v37 = vpop.xlane.xlu1 %1143 }
 0x285   : > { %1149 = vst.msk [vmem:[%s205_s7] sm:$0xff] %vm1148_vm15, %v1144_v37 }
 0x288   : > { %v1147_v38 = vpop.xlane.xlu0 %1146 }
 0x289   : > { %1150 = vst.msk [vmem:[%s205_s7 + $0x8] sm:$0xff] %vm1148_vm15, %v1147_v38 }
 0x28a   : > { %v1160_v39 = vpop.xlane.xlu1 %1159 }
 0x28b   : > { %1162 = vst.msk [vmem:[%s210_s10 + $0x8] sm:$0xff] %vm1148_vm15, %v1160_v39 }
 0x28c   : > { %v1157_v40 = vpop.xlane.xlu0 %1156 }
 0x28d   : > { %1161 = vst.msk [vmem:[%s210_s10] sm:$0xff] %vm1148_vm15, %v1157_v40 }
 0x28e PF: > { %s15_s15 = sadd.s32 1, %s1353_s15  }
 0x28f   : > { %p12_p4 = scmp.ge.s32.totalorder %s15_s15, 4  }
 0x291   :  { %14 = sbr.rel (!%p12_p4) target bundleno = 1 (0x1), region = 82 }

// kernel: stem_block_forward.3
= control target key start
LH: loop header
LB: loop body
LE: loop exit
PB: predicated region body
PF: predicated region fallthrough
CT: control target
= control target key end

     0   :  { %s2229_s18 = smov 0   ;;  %s2567_s0 = inlined_call_operand.vmem [shape: bf16[2,4,290], index: 0, kind: input, shape index: {}]   ;;  %s2568_s1 = inlined_call_operand.vmem [shape: bf16[9,16,4], index: 1, kind: input, shape index: {}]   ;;  %s2569_s2 = inlined_call_operand.vmem [shape: bf16[9,8,8], index: 2, kind: input, shape index: {}]   ;;  %s2570_s3 = inlined_call_operand.vmem [shape: bf16[2,256], index: 3, kind: input, shape index: {}]   ;;  %s2571_s4 = inlined_call_operand.vmem [shape: f32[8,4], index: 4, kind: input, shape index: {}]   ;;  %s2572_s5 = inlined_call_operand.vmem [shape: f32[2,8,256], index: 5, kind: output, shape index: {}]  }
   0x1 LB: > { %s2010_s19 = sadd.s32 4294967295, %s2177_s18   ;;  %p2014_p0 = scmp.ge.s32.totalorder %s2177_s18, 1  ;;  %s2177_s18 = sphi %s2229_s18, %s15_s18  }
   0x2   : > { %p187_p1 = scmp.lt.s32.totalorder %s2177_s18, 3 }
   0x4   : > { %p188_p2 = pnand %p2014_p0, %p187_p1 }
   0x5   : > { %p215_p3 = scmp.lt.s32.totalorder (!%p188_p2), %s2010_s19, 1  ;;  %s2181_s26 = smov (!%p188_p2), 2  }
   0x6   : > { %191 = sbr.rel (%p188_p2) target bundleno = 1007 (0x3ef), region = 40  ;;  %s2182_s27 = smov (!%p188_p2), 18  }
   0x7   : > { %s2183_s28 = smov (!%p188_p2), 16   ;;  %s2184_s29 = smov (!%p188_p2), 32  }
   0x8   : > { %s2185_s30 = smov (!%p188_p2), 34   ;;  %s2186_s6 = smov (!%p188_p2), 127  }
   0x9   : > { %s2187_s7 = smov (!%p188_p2), 111   ;;  %s2189_s10 = smov (!%p188_p2), 126  }
   0xa   : > { %s2190_s11 = smov (!%p188_p2), 112   ;;  %s2191_s14 = smov (!%p188_p2), 96  }
   0xb   : > { %v240_v0 = vlaneseq  ;;  %v2179_v1 = vmov 1966171168   ;;  %v2027_v3 = vld.sshfl [vmem:[%s2570_s3] sm:$0x11 pattern:$0x75316420] }
   0xc   : > { %v238_v2 = vunpack.c.l.s4 %v2179_v1  ;;  %v444_v6 = vcombine.high %v2027_v3, %v2027_v3  ;;  %v2180_v7 = vmov 1983009808   ;;  %s2580_s19 = smov (!%p215_p3, %s2010_s19), 1  ;;  %vm318_vm0 = vcmask 1041408   ;;  %v2159_v45 = vld [vmem:[%s2568_s1] sm:$0xff]   ;;  %s2192_s15 = smov 110  }
   0xd   : > { %v241_v4 = vshrl.u32 %v240_v0, 7  ;;  %v269_v8 = vunpack.c.l.s4 %v2180_v7  ;;  %s2121_s22 = smul.u32 6, %s2580_s19  ;;  %v2188_v44 = vmov 0   ;;  %vm314_vm1 = vcmask 31744   ;;  %s2193_s16 = smov 95  }
   0xe   : > { %v239_v5 = vunpack.c.0.s8 %v238_v2  ;;  %357 = vmatprep.mubr.bf16.mxu0 %v2188_v44  ;;  %423 = vmatprep.mubr.bf16.mxu1 %v2188_v44  ;;  %vm488_vm2 = vcmask 15360   ;;  %vm586_vm3 = vcmask 130048   ;;  %vm873_vm4 = vcmask 261120   ;;  %s2195_s17 = smov 94  }
   0xf   : > { %v256_v10 = vsub.s32 0, %v241_v4  ;;  %v270_v13 = vunpack.c.0.s8 %v269_v8  ;;  %s2254_s25 = scalar_lea.vmem %s2567_s0, %s2121_s22  ;;  %2150 = vset.pattern.permute.xlu1 %v2188_v44  ;;  %vm311_vm5 = vcmask 1039360   ;;  %vm775_vm6 = vcmask 146432   ;;  %s2119_s22 = sshll.u32 %s2580_s19, 4 }
  0x10   : > { %v242_v9 = vsub.s32 %v239_v5, %v241_v4  ;;  %v279_v29 = vld [vmem:[%s2254_s25] sm:$0x3f]  ;;  %vm1062_vm7 = vcmask 277504   ;;  %vm621_vm8 = vcmask 916480   ;;  %vm523_vm9 = vcmask 1031168  }
  0x11   : > { %v2242_v22 = vsub.s32 %v270_v13, %v241_v4  ;;  %v289_v31 = vcombine.high %v279_v29, %v279_v29  ;;  %v680_v32 = vld [vmem:[%s2254_s25] sm:$0x3f]  ;;  %vm712_vm10 = vcmask 908288   ;;  %vm908_vm11 = vcmask 785408  }
  0x12   : > { %v451_v11 = vrot.slane %v2027_v3, %v242_v9  ;;  %v458_v12 = vrot.slane %v444_v6, %v242_v9  ;;  %v690_v36 = vcombine.high %v680_v32, %v680_v32  ;;  %v226_v39 = vld [vmem:[%s2254_s25] sm:$0xf]  ;;  %vm810_vm12 = vcmask 900096  }
  0x13   : > { %v296_v30 = vrot.slane %v279_v29, %v2242_v22  ;;  %v303_v34 = vrot.slane %v289_v31, %v2242_v22  ;;  %v697_v35 = vrot.slane %v680_v32, %v2242_v22  ;;  %v434_v48 = vld [vmem:[%s2254_s25] sm:$0x3f]  ;;  %vm2574_vm13 = vcmask 777216  }
  0x14   : > { %v460_v14 = vshrl.u32 %v451_v11, 16  ;;  %v468_v15 = vshrl.u32 %v458_v12, 16  ;;  %v252_v16 = vpack.i.b16 %v451_v11, %v451_v11  ;;  %v259_v17 = vpack.i.b16 %v458_v12, %v458_v12  ;;  %v582_v54 = vld [vmem:[%s2254_s25] sm:$0x3f]  ;;  %v2158_v12 = vld [vmem:[%s2568_s1 + $0x8] sm:$0xff]  }
  0x15   : > { %v304_v33 = vcombine.high %v296_v30, %v296_v30  ;;  %v705_v37 = vcombine.high %v697_v35, %v697_v35  ;;  %v704_v38 = vrot.slane %v690_v36, %v2242_v22  ;;  %v869_v1 = vld [vmem:[%s2254_s25] sm:$0x3f]  ;;  %vm2573_vm14 = vcmask 769024  }
  0x16   : > { %v461_v18 = vpack.i.b16 %v460_v14, %v460_v14  ;;  %v469_v19 = vpack.i.b16 %v468_v15, %v468_v15  ;;  %v257_v20 = vrot.slane %v252_v16, %v256_v10  ;;  %v264_v21 = vrot.slane %v259_v17, %v256_v10  ;;  %v771_v13 = vld [vmem:[%s2254_s25] sm:$0x3f] }
  0x17   : > { %vm1172_vm15 = vcmask 134144  }
  0x18   : > { %v466_v23 = vrot.slane %v461_v18, %v256_v10  ;;  %v474_v24 = vrot.slane %v469_v19, %v256_v10  ;;  %v2247_v26 = vcombine.low %v257_v20, %v264_v21  ;;  %1173 = vst.msk [vmem:[#allocation2] sm:$0xf] %vm1172_vm15, %v2188_v44 }
  0x1a   : > { %v2245_v25 = vcombine.low %v466_v23, %v474_v24  ;;  %v274_v28 = vrot.slane %v2247_v26, %v2242_v22  ;;  %v967_v23 = vld [vmem:[%s2254_s25] sm:$0x3f] }
  0x1b   : > { %v984_v29 = vrot.slane %v967_v23, %v2242_v22  ;;  %v977_v36 = vcombine.high %v967_v23, %v967_v23  ;;  %v2165_v23 = vld [vmem:[%s2568_s1 + $0x38] sm:$0xff]  }
  0x1c   : > { %v484_v27 = vrot.slane %v2245_v25, %v2242_v22  ;;  %v276_v40 = vmul.bf16 %v274_v28, %v226_v39 }
  0x1d   : > { %v991_v39 = vrot.slane %v977_v36, %v2242_v22 }
  0x1e   : > { %485 = vrot.lane.b32.xlu0 %v484_v27, %s2181_s26  ;;  %772 = vrot.lane.b32.xlu1 %v484_v27, %s2182_s27  ;;  %v380_v41 = vrot.slane %v276_v40, %v2242_v22  ;;  %v2194_v40 = vmov 1  }
  0x1f   : > { %2151 = vset.pattern.permute.xlu0 %v2194_v40 }
  0x20   : > { %v381_v42 = vcombine.high %v380_v41, %v380_v41  ;;  %v386_v43 = vsel %vm318_vm0, %v380_v41, 0 }
  0x22   : > { %583 = vrot.lane.b32.xlu0 %v274_v28, %s2183_s28  ;;  %870 = vrot.lane.b32.xlu1 %v274_v28, %s2184_s29 }
  0x23   : > { %2025 = vmatprep.subr.msk.bf16.mxu1 %vm318_vm0, %v381_v42 }
  0x24   : > { %406 = vmatpush1.bf16.msra.mxu1 %v386_v43  ;;  %v2340_v43 = vld [vmem:[%s2571_s4] sm:$0xff] }
  0x26   : > { %1059 = vrot.lane.b32.xlu0 %v484_v27, %s2185_s30  ;;  %305 = vrot.lane.b32.xlu1 %v296_v30, %s2186_s6  ;;  %v1058_v30 = vld [vmem:[%s2254_s25] sm:$0x3f]  ;;  %s224_s25 = scalar_lea.vmem %s2572_s5, %s2119_s22 }
  0x27   : > { %2026 = vmatmul.mubr.msk.bf16.vlgmr.msra.gmra.mxu1 %vm314_vm1, %v2159_v45 }
  0x28   : > { %665 = vmatprep.mubr.bf16.mxu1 %v2188_v44 }
  0x2a   : > { %307 = vrot.lane.b32.xlu0 %v304_v33, %s2186_s6  ;;  %309 = vrot.lane.b32.xlu1 %v303_v34, %s2186_s6 }
  0x2e   : > { %706 = vrot.lane.b32.xlu0 %v697_v35, %s2187_s7  ;;  %708 = vrot.lane.b32.xlu1 %v705_v37, %s2187_s7  ;;  %v992_v35 = vcombine.high %v984_v29, %v984_v29 }
  0x32   : > { %710 = vrot.lane.b32.xlu0 %v704_v38, %s2187_s7 }
  0x90   : > { %v486_v46 = vpop.permute.xlu0 %485  ;;  %v773_v47 = vpop.permute.xlu1 %772 }
  0x91   : > { %v487_v49 = vrot.slane %v486_v46, 6  ;;  %v774_v0 = vrot.slane %v773_v47, 6 }
  0x93   : > { %v489_v50 = vsel %vm488_vm2, %v487_v49, %v486_v46  ;;  %v776_v14 = vsel %vm775_vm6, %v774_v0, %v773_v47 }
  0x94   : > { %v491_v51 = vmul.bf16 %v489_v50, %v434_v48  ;;  %v584_v52 = vpop.permute.xlu0 %583  ;;  %v871_v53 = vpop.permute.xlu1 %870  ;;  %v778_v16 = vmul.bf16 %v776_v14, %v771_v13  ;;  %v2163_v14 = vld [vmem:[%s2568_s1 + $0x28] sm:$0xff]  }
  0x95   : > { %v585_v55 = vrot.slane %v584_v52, 6  ;;  %v872_v58 = vrot.slane %v871_v53, 6 }
  0x96   : > { %v508_v56 = vrot.slane %v491_v51, %v2242_v22  ;;  %v501_v3 = vcombine.high %v491_v51, %v491_v51  ;;  %v795_v20 = vrot.slane %v778_v16, %v2242_v22  ;;  %v788_v27 = vcombine.high %v778_v16, %v778_v16 }
  0x97   : > { %v587_v57 = vsel %vm586_vm3, %v585_v55, %v584_v52  ;;  %v874_v2 = vsel %vm873_vm4, %v872_v58, %v871_v53  ;;  %v2161_v55 = vld [vmem:[%s2568_s1 + $0x18] sm:$0xff]  }
  0x98   : > { %v589_v59 = vmul.bf16 %v587_v57, %v582_v54  ;;  %517 = vrot.lane.b32.xlu0 %v508_v56, %s2189_s10  ;;  %v1060_v60 = vpop.permute.xlu0 %1059  ;;  %v306_v61 = vpop.permute.xlu1 %305  ;;  %v876_v9 = vmul.bf16 %v874_v2, %v869_v1  ;;  %v515_v15 = vrot.slane %v501_v3, %v2242_v22  ;;  %v516_v17 = vcombine.high %v508_v56, %v508_v56 }
  0x99   : > { %v1061_v21 = vrot.slane %v1060_v60, 6  ;;  %v803_v32 = vcombine.high %v795_v20, %v795_v20  ;;  %v802_v34 = vrot.slane %v788_v27, %v2242_v22 }
  0x9a   : > { %v599_v62 = vcombine.high %v589_v59, %v589_v59  ;;  %v606_v63 = vrot.slane %v589_v59, %v2242_v22  ;;  %v893_v18 = vrot.slane %v876_v9, %v2242_v22  ;;  %v886_v19 = vcombine.high %v876_v9, %v876_v9 }
  0x9b   : > { %v1063_v31 = vsel %vm1062_vm7, %v1061_v21, %v1060_v60 }
  0x9c   : > { %615 = vrot.lane.b32.xlu1 %v606_v63, %s2190_s11  ;;  %v614_v4 = vcombine.high %v606_v63, %v606_v63  ;;  %v308_v5 = vpop.permute.xlu0 %307  ;;  %v310_v6 = vpop.permute.xlu1 %309  ;;  %v613_v10 = vrot.slane %v599_v62, %v2242_v22  ;;  %v900_v24 = vrot.slane %v886_v19, %v2242_v22  ;;  %v901_v28 = vcombine.high %v893_v18, %v893_v18 }
  0x9d   : > { %v313_v7 = vsel %vm311_vm5, %v308_v5, %v310_v6  ;;  %v312_v8 = vsel %vm311_vm5, %v306_v61, %v308_v5  ;;  %v1065_v33 = vmul.bf16 %v1063_v31, %v1058_v30  ;;  %v2160_v61 = vld [vmem:[%s2568_s1 + $0x10] sm:$0xff]   ;;  %v2162_v6 = vld [vmem:[%s2568_s1 + $0x20] sm:$0xff]  }
  0x9e   : > { %617 = vrot.lane.b32.xlu0 %v614_v4, %s2190_s11  ;;  %2022 = vmatprep.subr.msk.bf16.mxu0 %vm318_vm0, %v313_v7  ;;  %v320_v11 = vsel %vm318_vm0, %v312_v8, 0  ;;  %v2166_v31 = vld [vmem:[%s2568_s1 + $0x40] sm:$0xff]  }
  0x9f   : > { %340 = vmatpush1.bf16.msra.mxu0 %v320_v11  ;;  %v1082_v37 = vrot.slane %v1065_v33, %v2242_v22  ;;  %v1075_v38 = vcombine.high %v1065_v33, %v1065_v33 }
  0xa0   : > { %619 = vrot.lane.b32.xlu1 %v613_v10, %s2190_s11  ;;  %v707_v45 = vpop.permute.xlu0 %706  ;;  %v709_v47 = vpop.permute.xlu1 %708 }
  0xa1   : > { %v1089_v41 = vrot.slane %v1075_v38, %v2242_v22  ;;  %v1090_v42 = vcombine.high %v1082_v37, %v1082_v37  ;;  %v713_v62 = vsel %vm712_vm10, %v707_v45, %v709_v47 }
  0xa2   : > { %521 = vrot.lane.b32.xlu0 %v515_v15, %s2189_s10  ;;  %2023 = vmatmul.mubr.msk.bf16.vlgmr.msra.gmra.mxu0 %vm314_vm1, %v2158_v12  ;;  %v719_v1 = vsel %vm318_vm0, %v713_v62, 0 }
  0xa3   : > { %567 = vmatprep.mubr.bf16.mxu0 %v2188_v44 }
  0xa4   : > { %519 = vrot.lane.b32.xlu1 %v516_v17, %s2189_s10  ;;  %v711_v46 = vpop.permute.xlu0 %710  ;;  %v2164_v17 = vld [vmem:[%s2568_s1 + $0x30] sm:$0xff]  }
  0xa5   : > { %v714_v63 = vsel %vm712_vm10, %v709_v47, %v711_v46 }
  0xa6   : > { %902 = vrot.lane.b32.xlu0 %v893_v18, %s2191_s14 }
  0xa8   : > { %804 = vrot.lane.b32.xlu1 %v795_v20, %s2192_s15 }
  0xaa   : > { %906 = vrot.lane.b32.xlu0 %v900_v24, %s2191_s14 }
  0xac   : > { %904 = vrot.lane.b32.xlu1 %v901_v28, %s2191_s14 }
  0xae   : > { %806 = vrot.lane.b32.xlu0 %v803_v32, %s2192_s15 }
  0xb0   : > { %808 = vrot.lane.b32.xlu1 %v802_v34, %s2192_s15 }
  0xb2   : > { %995 = vrot.lane.b32.xlu0 %v992_v35, %s2193_s16 }
  0xb4   : > { %993 = vrot.lane.b32.xlu1 %v984_v29, %s2193_s16 }
  0xb6   : > { %1091 = vrot.lane.b32.xlu0 %v1082_v37, %s2195_s17 }
  0xb8   : > { %997 = vrot.lane.b32.xlu1 %v991_v39, %s2193_s16 }
  0xba   : > { %1095 = vrot.lane.b32.xlu0 %v1089_v41, %s2195_s17 }
  0xbc   : > { %1093 = vrot.lane.b32.xlu1 %v1090_v42, %s2195_s17 }
  0xbe   : > { %1165 = vperm.xlu0 %2151, %v2340_v43  }
  0xc0   : > { %1159 = vperm.xlu1 %2150, %v2340_v43  }
  0xc2   : > { %1493 = vrot.lane.b32.xlu0 %v2247_v26, %s2183_s28  ;;  %s2196_s28 = smov 17  }
  0xc6   : > { %1719 = vrot.lane.b32.xlu0 %v2247_v26, %s2184_s29 }
  0xe7   : > { %v425_v32 = vpop.f32.mrf.mxu1 }
  0xe9   : > { %v427_v34 = vpop.f32.mrf.mxu1 }
  0xeb   : > { %v429_v37 = vpop.f32.mrf.mxu1 }
  0xed   : > { %v431_v39 = vpop.f32.mrf.mxu1 }
 0x10a   : > { %v518_v48 = vpop.permute.xlu0 %517 }
 0x10e   : > { %v616_v49 = vpop.permute.xlu1 %615 }
 0x110   : > { %v618_v22 = vpop.permute.xlu0 %617 }
 0x111   : > { %v622_v50 = vsel %vm621_vm8, %v616_v49, %v618_v22 }
 0x112   : > { %v620_v51 = vpop.permute.xlu1 %619  ;;  %v628_v53 = vsel %vm318_vm0, %v622_v50, 0 }
 0x113   : > { %v623_v52 = vsel %vm621_vm8, %v618_v22, %v620_v51 }
 0x114   : > { %v522_v54 = vpop.permute.xlu0 %521  ;;  %2036 = vmatprep.subr.msk.bf16.mxu1 %vm318_vm0, %v623_v52 }
 0x115   : > { %648 = vmatpush1.bf16.msra.mxu1 %v628_v53 }
 0x116   : > { %v520_v56 = vpop.permute.xlu1 %519 }
 0x117   : > { %v524_v57 = vsel %vm523_vm9, %v518_v48, %v520_v56  ;;  %v525_v58 = vsel %vm523_vm9, %v520_v56, %v522_v54 }
 0x118   : > { %v530_v59 = vsel %vm318_vm0, %v524_v57, 0  ;;  %v903_v60 = vpop.permute.xlu0 %902  ;;  %2031 = vmatprep.subr.msk.bf16.mxu0 %vm318_vm0, %v525_v58  ;;  %2037 = vmatmul.mubr.msk.bf16.vlgmr.msra.gmra.mxu1 %vm314_vm1, %v2161_v55 }
 0x119   : > { %550 = vmatpush1.bf16.msra.mxu0 %v530_v59  ;;  %854 = vmatprep.mubr.bf16.mxu1 %v2188_v44 }
 0x11a   : > { %2041 = vmatprep.subr.msk.bf16.mxu0 %vm318_vm0, %v714_v63  ;;  %v805_v0 = vpop.permute.xlu1 %804 }
 0x11c   : > { %v907_v2 = vpop.permute.xlu0 %906  ;;  %2032 = vmatmul.mubr.msk.bf16.vlgmr.msra.gmra.mxu0 %vm314_vm1, %v2160_v61 }
 0x11d   : > { %739 = vmatpush1.bf16.msra.mxu0 %v719_v1  ;;  %756 = vmatprep.mubr.bf16.mxu0 %v2188_v44 }
 0x11e   : > { %v905_v3 = vpop.permute.xlu1 %904 }
 0x11f   : > { %v910_v4 = vsel %vm908_vm11, %v905_v3, %v907_v2  ;;  %v909_v7 = vsel %vm908_vm11, %v903_v60, %v905_v3 }
 0x120   : > { %v807_v5 = vpop.permute.xlu0 %806  ;;  %2051 = vmatprep.subr.msk.bf16.mxu0 %vm318_vm0, %v910_v4  ;;  %v915_v11 = vsel %vm318_vm0, %v909_v7, 0 }
 0x121   : > { %v811_v8 = vsel %vm810_vm12, %v805_v0, %v807_v5 }
 0x122   : > { %v809_v9 = vpop.permute.xlu1 %808  ;;  %v817_v12 = vsel %vm318_vm0, %v811_v8, 0 }
 0x123   : > { %v812_v10 = vsel %vm810_vm12, %v807_v5, %v809_v9 }
 0x124   : > { %v996_v13 = vpop.permute.xlu0 %995  ;;  %2042 = vmatmul.mubr.msk.bf16.vlgmr.msra.gmra.mxu0 %vm314_vm1, %v2162_v6  ;;  %2046 = vmatprep.subr.msk.bf16.mxu1 %vm318_vm0, %v812_v10 }
 0x125   : > { %935 = vmatpush1.bf16.msra.mxu0 %v915_v11  ;;  %837 = vmatpush1.bf16.msra.mxu1 %v817_v12 }
 0x126   : > { %v994_v15 = vpop.permute.xlu1 %993  ;;  %952 = vmatprep.mubr.bf16.mxu0 %v2188_v44 }
 0x127   : > { %v1000_v18 = vsel %vm2574_vm13, %v994_v15, %v996_v13 }
 0x128   : > { %v1092_v16 = vpop.permute.xlu0 %1091  ;;  %2047 = vmatmul.mubr.msk.bf16.vlgmr.msra.gmra.mxu1 %vm314_vm1, %v2163_v14  ;;  %v1006_v21 = vsel %vm318_vm0, %v1000_v18, 0 }
 0x129   : > { %1043 = vmatprep.mubr.bf16.mxu1 %v2188_v44 }
 0x12a   : > { %v998_v19 = vpop.permute.xlu1 %997 }
 0x12b   : > { %v1001_v20 = vsel %vm2574_vm13, %v996_v13, %v998_v19 }
 0x12c   : > { %2052 = vmatmul.mubr.msk.bf16.vlgmr.msra.gmra.mxu0 %vm314_vm1, %v2164_v17  ;;  %2056 = vmatprep.subr.msk.bf16.mxu1 %vm318_vm0, %v1001_v20  ;;  %v1096_v24 = vpop.permute.xlu0 %1095 }
 0x12d   : > { %1026 = vmatpush1.bf16.msra.mxu1 %v1006_v21  ;;  %1141 = vmatprep.mubr.bf16.mxu0 %v2188_v44 }
 0x12e   : > { %v1094_v27 = vpop.permute.xlu1 %1093 }
 0x12f   : > { %v1098_v28 = vsel %vm2573_vm14, %v1092_v16, %v1094_v27  ;;  %v1099_v29 = vsel %vm2573_vm14, %v1094_v27, %v1096_v24  ;;  %vm1186_vm14 = vcmask 138240  }
 0x130   : > { %v1104_v30 = vsel %vm318_vm0, %v1098_v28, 0  ;;  %2057 = vmatmul.mubr.msk.bf16.vlgmr.msra.gmra.mxu1 %vm314_vm1, %v2165_v23  ;;  %2061 = vmatprep.subr.msk.bf16.mxu0 %vm318_vm0, %v1099_v29  ;;  %vm1174_vm0 = vcmask 273544  }
 0x131   : > { %1124 = vmatpush1.bf16.msra.mxu0 %v1104_v30  ;;  %1304 = vmatprep.mubr.bf16.mxu1 %v2188_v44  ;;  %1175 = vst.msk [vmem:[#allocation2 + $0x8] sm:$0xf] %vm1174_vm0, %v2188_v44  ;;  %vm1191_vm0 = vcmask 1047556  }
 0x134   : > { %2062 = vmatmul.mubr.msk.bf16.vlgmr.msra.gmra.mxu0 %vm314_vm1, %v2166_v31  ;;  %vm1190_vm1 = vcmask 1043592  }
 0x135   : > { %1359 = vmatprep.mubr.bf16.mxu0 %v2188_v44  ;;  %vm1192_vm13 = vmor %vm1191_vm0, %vm1190_vm1 }
 0x13b   : > { %v1160_v27 = vpop.permute.xlu1 %1159 }
 0x162   : > { %v359_v33 = vpop.f32.mrf.mxu0 }
 0x163   : > { %v426_v55 = vadd.f32 %v425_v32, %v359_v33  ;;  %v1166_v33 = vpop.permute.xlu0 %1165 }
 0x164   : > { %v361_v35 = vpop.f32.mrf.mxu0 }
 0x165   : > { %v428_v58 = vadd.f32 %v427_v34, %v361_v35 }
 0x166   : > { %v363_v36 = vpop.f32.mrf.mxu0 }
 0x167   : > { %v430_v38 = vadd.f32 %v429_v37, %v363_v36 }
 0x168   : > { %v365_v41 = vpop.f32.mrf.mxu0 }
 0x169   : > { %v432_v49 = vadd.f32 %v431_v39, %v365_v41 }
 0x1d8   : > { %v667_v40 = vpop.f32.mrf.mxu1 }
 0x1da   : > { %v669_v45 = vpop.f32.mrf.mxu1 }
 0x1dc   : > { %v569_v42 = vpop.f32.mrf.mxu0  ;;  %v671_v48 = vpop.f32.mrf.mxu1 }
 0x1dd   : > { %v578_v59 = vadd.f32 %v569_v42, %v426_v55 }
 0x1de   : > { %v571_v46 = vpop.f32.mrf.mxu0  ;;  %v673_v53 = vpop.f32.mrf.mxu1 }
 0x1df   : > { %v579_v62 = vadd.f32 %v571_v46, %v428_v58  ;;  %v676_v2 = vadd.f32 %v667_v40, %v578_v59 }
 0x1e0   : > { %v573_v47 = vpop.f32.mrf.mxu0 }
 0x1e1   : > { %v580_v22 = vadd.f32 %v573_v47, %v430_v38  ;;  %v677_v6 = vadd.f32 %v669_v45, %v579_v62  ;;  %v2197_v47 = vmov 2  }
 0x1e2   : > { %v575_v50 = vpop.f32.mrf.mxu0  ;;  %2152 = vset.pattern.permute.xlu0 %v2197_v47 }
 0x1e3   : > { %v678_v51 = vadd.f32 %v671_v48, %v580_v22  ;;  %v581_v52 = vadd.f32 %v575_v50, %v432_v49 }
 0x1e4   : > { %v758_v54 = vpop.f32.mrf.mxu0 }
 0x1e5   : > { %v679_v56 = vadd.f32 %v673_v53, %v581_v52  ;;  %v767_v7 = vadd.f32 %v758_v54, %v676_v2  ;;  %v1494_v53 = vpop.permute.xlu0 %1493 }
 0x1e6   : > { %v760_v57 = vpop.f32.mrf.mxu0  ;;  %v1495_v59 = vrot.slane %v1494_v53, 4 }
 0x1e7   : > { %v768_v11 = vadd.f32 %v760_v57, %v677_v6 }
 0x1e8   : > { %v762_v60 = vpop.f32.mrf.mxu0  ;;  %v856_v61 = vpop.f32.mrf.mxu1 }
 0x1e9   : > { %v769_v63 = vadd.f32 %v762_v60, %v678_v51  ;;  %v865_v12 = vadd.f32 %v856_v61, %v767_v7 }
 0x1ea   : > { %v764_v0 = vpop.f32.mrf.mxu0  ;;  %v858_v1 = vpop.f32.mrf.mxu1 }
 0x1eb   : > { %v770_v3 = vadd.f32 %v764_v0, %v679_v56  ;;  %v866_v16 = vadd.f32 %v858_v1, %v768_v11 }
 0x1ec   : > { %v860_v4 = vpop.f32.mrf.mxu1  ;;  %v954_v5 = vpop.f32.mrf.mxu0 }
 0x1ed   : > { %v867_v8 = vadd.f32 %v860_v4, %v769_v63  ;;  %v963_v17 = vadd.f32 %v954_v5, %v865_v12  ;;  %v1720_v63 = vpop.permute.xlu0 %1719  ;;  %v1241_v5 = vld [vmem:[%s2569_s2] sm:$0xf] }
 0x1ee   : > { %v862_v9 = vpop.f32.mrf.mxu1  ;;  %v956_v10 = vpop.f32.mrf.mxu0 }
 0x1ef   : > { %v868_v13 = vadd.f32 %v862_v9, %v770_v3  ;;  %v964_v21 = vadd.f32 %v956_v10, %v866_v16  ;;  %v1721_v3 = vrot.slane %v1720_v63, 4 }
 0x1f0   : > { %v958_v14 = vpop.f32.mrf.mxu0  ;;  %v1045_v15 = vpop.f32.mrf.mxu1 }
 0x1f1   : > { %v965_v18 = vadd.f32 %v958_v14, %v867_v8  ;;  %v1054_v23 = vadd.f32 %v1045_v15, %v963_v17  ;;  %v1496_v14 = vsel %vm586_vm3, %v1495_v59, %v1494_v53 }
 0x1f2   : > { %v960_v19 = vpop.f32.mrf.mxu0  ;;  %v1047_v20 = vpop.f32.mrf.mxu1 }
 0x1f3   : > { %v2414_v24 = vadd.f32 %v960_v19, %v868_v13  ;;  %v1055_v30 = vadd.f32 %v1047_v20, %v964_v21 }
 0x1f4   : > { %v1049_v28 = vpop.f32.mrf.mxu1  ;;  %v1143_v29 = vpop.f32.mrf.mxu0 }
 0x1f5   : > { %v1152_v31 = vadd.f32 %v1143_v29, %v1054_v23  ;;  %v1056_v34 = vadd.f32 %v1049_v28, %v965_v18 }
 0x1f6   : > { %v1145_v32 = vpop.f32.mrf.mxu0 }
 0x1f7   : > { %v1153_v35 = vadd.f32 %v1145_v32, %v1055_v30  ;;  %v1162_v36 = vmul.f32 %v1160_v27, %v1152_v31 }
 0x1f8   : > { %v1147_v37 = vpop.f32.mrf.mxu0 }
 0x1f9   : > { %v1163_v38 = vmul.f32 %v1160_v27, %v1153_v35  ;;  %v1168_v39 = vadd.f32 %v1166_v33, %v1162_v36  ;;  %v2416_v40 = vadd.f32 %v1147_v37, %v1056_v34  ;;  %v1722_v27 = vsel %vm873_vm4, %v1721_v3, %v1720_v63 }
 0x1fa   : > { %vm2577_vm4 = vcmask 769024  }
 0x1fb   : > { %v1169_v41 = vadd.f32 %v1166_v33, %v1163_v38  ;;  %v1170_v42 = vmax.f32 %v1168_v39, 0.0 }
 0x1fd   : > { %v1171_v45 = vmax.f32 %v1169_v41, 0.0  ;;  %v2198_v41 = vmov 3  }
 0x1fe   : > { %2153 = vset.pattern.permute.xlu1 %v2198_v41 }
 0x1ff   : > { %v2120_v46 = vpack.c.bf16 %v1171_v45, %v1170_v42 }
 0x201   : > { %1183 = vrot.lane.b32.xlu1 %v2120_v46, %s2196_s28 }
 0x205   : > { %1413 = vrot.lane.b32.xlu1 %v2245_v25, %s2181_s26 }
 0x209   : > { %1641 = vrot.lane.b32.xlu1 %v2245_v25, %s2182_s27 }
 0x20d   : > { %1859 = vrot.lane.b32.xlu1 %v2245_v25, %s2185_s30 }
 0x273   : > { %v1184_v48 = vpop.permute.xlu1 %1183 }
 0x274   : > { %v1185_v49 = vrot.slane %v1184_v48, 4 }
 0x276   : > { %v1187_v22 = vsel %vm1186_vm14, %v1185_v49, %v1184_v48  ;;  %1194 = vst.msk [vmem:[#allocation2 + $0x8] sm:$0xf] %vm1172_vm15, %v1185_v49  ;;  %vm1261_vm14 = vcmask 64512  }
 0x277   : > { %1193 = vst.msk [vmem:[#allocation2] sm:$0xff] %vm1192_vm13, %v1187_v22  ;;  %v1414_v54 = vpop.permute.xlu1 %1413  ;;  %vm1265_vm13 = vcmask 1043456  }
 0x278   : > { %v1415_v60 = vrot.slane %v1414_v54, 4 }
 0x27a   : > { %v1416_v10 = vsel %vm488_vm2, %v1415_v60, %v1414_v54  ;;  %vm2575_vm2 = vcmask 777216  }
 0x27b   : > { %v1642_v0 = vpop.permute.xlu1 %1641  ;;  %vm2576_vm3 = vmmov %vm2575_vm2 }
 0x27c   : > { %v1643_v4 = vrot.slane %v1642_v0, 4 }
 0x27d   : > { %v2425_v50 = vld [vmem:[#allocation2 + $0x8] sm:$0xf] }
 0x27e   : > { %v1242_v51 = vld [vmem:[#allocation2 + $0x8] sm:$0xf]  ;;  %v2427_v52 = vld [vmem:[#allocation2] sm:$0xff]  ;;  %v2431_v25 = vcombine.low %v2425_v50, %v2425_v50  ;;  %v1500_v1 = vmul.bf16 %v1495_v59, %v2425_v50  ;;  %v1726_v6 = vmul.bf16 %v1721_v3, %v2425_v50  ;;  %v1648_v7 = vmul.bf16 %v1643_v4, %v2425_v50 }
 0x27f   : > { %v2069_v55 = vcombine.low %v1242_v51, %v1242_v51  ;;  %v1240_v56 = vmul.bf16 %v2427_v52, %v2247_v26  ;;  %v2068_v61 = vcombine.high %v2427_v52, %v2427_v52  ;;  %v2067_v62 = vcombine.low %v2427_v52, %v2427_v52  ;;  %v1860_v21 = vpop.permute.xlu1 %1859 }
 0x280   : > { %1585 = vrot.lane.b32.xlu1 %v2431_v25, %s2187_s7  ;;  %v1420_v2 = vmul.bf16 %v1415_v60, %v1242_v51  ;;  %v2087_v8 = vcombine.low %v1500_v1, %v1500_v1  ;;  %v1419_v11 = vmul.bf16 %v2427_v52, %v1416_v10  ;;  %v2105_v12 = vcombine.low %v1726_v6, %v1726_v6 }
 0x281   : > { %1257 = vrot.lane.b32.xlu0 %v2069_v55, %s2186_s6  ;;  %v2073_v57 = vcombine.high %v1240_v56, %v1240_v56  ;;  %v2072_v58 = vcombine.low %v1240_v56, %v1240_v56  ;;  %v2099_v13 = vcombine.low %v1648_v7, %v1648_v7  ;;  %v1499_v15 = vmul.bf16 %v1496_v14, %v2427_v52  ;;  %v2090_v7 = vld [vmem:[%s2569_s2 + $0x10] sm:$0xf] }
 0x282   : > { %v2081_v9 = vcombine.low %v1420_v2, %v1420_v2  ;;  %v2079_v16 = vcombine.low %v1419_v11, %v1419_v11  ;;  %v2080_v17 = vcombine.high %v1419_v11, %v1419_v11  ;;  %v1644_v20 = vsel %vm775_vm6, %v1643_v4, %v1642_v0  ;;  %v2084_v4 = vld [vmem:[%s2569_s2 + $0xc] sm:$0xf] }
 0x283   : > { %2074 = vmatprep.subr.msk.bf16.mxu0 %vm1265_vm13, %v2073_v57  ;;  %v1322_v26 = vsel %vm1265_vm13, %v2072_v58, 0  ;;  %v2086_v18 = vcombine.high %v1499_v15, %v1499_v15  ;;  %v2085_v19 = vcombine.low %v1499_v15, %v1499_v15  ;;  %v1647_v23 = vmul.bf16 %v1644_v20, %v2427_v52  ;;  %v2102_v20 = vld [vmem:[%s2569_s2 + $0x18] sm:$0xf] }
 0x284   : > { %1255 = vrot.lane.b32.xlu1 %v2068_v61, %s2186_s6  ;;  %1342 = vmatpush1.bf16.msra.mxu0 %v1322_v26  ;;  %v1861_v28 = vrot.slane %v1860_v21, 4  ;;  %v1725_v29 = vmul.bf16 %v1722_v27, %v2427_v52 }
 0x285   : > { %1253 = vrot.lane.b32.xlu0 %v2067_v62, %s2186_s6  ;;  %v2098_v30 = vcombine.high %v1647_v23, %v1647_v23  ;;  %v2097_v31 = vcombine.low %v1647_v23, %v1647_v23 }
 0x286   : > { %v1862_v32 = vsel %vm1062_vm7, %v1861_v28, %v1860_v21  ;;  %v2103_v34 = vcombine.low %v1725_v29, %v1725_v29  ;;  %v2104_v35 = vcombine.high %v1725_v29, %v1725_v29  ;;  %v1866_v36 = vmul.bf16 %v1861_v28, %v2425_v50  ;;  %v2066_v50 = vld [vmem:[%s2569_s2 + $0x4] sm:$0xf]  ;;  %v2108_v29 = vld [vmem:[%s2569_s2 + $0x1c] sm:$0xf] }
 0x287   : > { %2075 = vmatmul.mubr.msk.bf16.vlgmr.msra.gmra.mxu0 %vm1261_vm14, %v1241_v5  ;;  %v1865_v33 = vmul.bf16 %v1862_v32, %v2427_v52 }
 0x288   : > { %1581 = vrot.lane.b32.xlu1 %v2067_v62, %s2187_s7  ;;  %1560 = vmatprep.mubr.bf16.mxu0 %v2188_v44  ;;  %v2114_v39 = vcombine.low %v1866_v36, %v1866_v36 }
 0x289   : > { %1583 = vrot.lane.b32.xlu0 %v2068_v61, %s2187_s7  ;;  %v2112_v37 = vcombine.low %v1865_v33, %v1865_v33  ;;  %v2113_v38 = vcombine.high %v1865_v33, %v1865_v33 }
 0x28c   : > { %1435 = vrot.lane.b32.xlu1 %v2081_v9, %s2189_s10 }
 0x28d   : > { %1515 = vrot.lane.b32.xlu0 %v2087_v8, %s2190_s11 }
 0x290   : > { %1741 = vrot.lane.b32.xlu1 %v2105_v12, %s2191_s14 }
 0x291   : > { %1663 = vrot.lane.b32.xlu0 %v2099_v13, %s2192_s15  ;;  %v2096_v13 = vld [vmem:[%s2569_s2 + $0x14] sm:$0xf] }
 0x294   : > { %1431 = vrot.lane.b32.xlu1 %v2079_v16, %s2189_s10 }
 0x295   : > { %1433 = vrot.lane.b32.xlu0 %v2080_v17, %s2189_s10 }
 0x298   : > { %1513 = vrot.lane.b32.xlu1 %v2086_v18, %s2190_s11 }
 0x299   : > { %1511 = vrot.lane.b32.xlu0 %v2085_v19, %s2190_s11 }
 0x29c   : > { %1801 = vrot.lane.b32.xlu1 %v2068_v61, %s2193_s16 }
 0x29d   : > { %1799 = vrot.lane.b32.xlu0 %v2067_v62, %s2193_s16  ;;  %v2078_v62 = vld [vmem:[%s2569_s2 + $0x8] sm:$0xf] }
 0x2a0   : > { %1661 = vrot.lane.b32.xlu1 %v2098_v30, %s2192_s15 }
 0x2a1   : > { %1659 = vrot.lane.b32.xlu0 %v2097_v31, %s2192_s15 }
 0x2a4   : > { %1737 = vrot.lane.b32.xlu1 %v2103_v34, %s2191_s14 }
 0x2a5   : > { %1739 = vrot.lane.b32.xlu0 %v2104_v35, %s2191_s14  ;;  %v2111_v35 = vld [vmem:[%s2569_s2 + $0x20] sm:$0xf] }
 0x2a8   : > { %1877 = vrot.lane.b32.xlu1 %v2112_v37, %s2195_s17 }
 0x2a9   : > { %1803 = vrot.lane.b32.xlu0 %v2431_v25, %s2193_s16 }
 0x2ac   : > { %1881 = vrot.lane.b32.xlu1 %v2114_v39, %s2195_s17 }
 0x2ad   : > { %1879 = vrot.lane.b32.xlu0 %v2113_v38, %s2195_s17 }
 0x2b0   : > { %1948 = vperm.xlu1 %2153, %v2340_v43  }
 0x2b1   : > { %1940 = vperm.xlu0 %2152, %v2340_v43  }
 0x2b5   : > { %2154 = vset.pattern.permute.xlu0 %v2198_v41  ;;  %v1051_v41 = vpop.f32.mrf.mxu1 }
 0x2f2   : > { %v1586_v45 = vpop.permute.xlu1 %1585 }
 0x2f3   : > { %v1258_v42 = vpop.permute.xlu0 %1257 }
 0x2f6   : > { %v1256_v47 = vpop.permute.xlu1 %1255 }
 0x2f7   : > { %v1254_v46 = vpop.permute.xlu0 %1253  ;;  %v1260_v49 = vsel %vm311_vm5, %v1256_v47, %v1258_v42 }
 0x2f8   : > { %v1259_v48 = vsel %vm311_vm5, %v1254_v46, %v1256_v47  ;;  %2070 = vmatprep.subr.msk.bf16.mxu1 %vm1265_vm13, %v1260_v49  ;;  %vm2578_vm5 = vmmov %vm2577_vm4 }
 0x2f9   : > { %v1267_v22 = vsel %vm1265_vm13, %v1259_v48, 0 }
 0x2fa   : > { %1287 = vmatpush1.bf16.msra.mxu1 %v1267_v22  ;;  %v1582_v43 = vpop.permute.xlu1 %1581 }
 0x2fb   : > { %v1584_v51 = vpop.permute.xlu0 %1583 }
 0x2fc   : > { %v1588_v60 = vsel %vm712_vm10, %v1584_v51, %v1586_v45  ;;  %v1587_v61 = vsel %vm712_vm10, %v1582_v43, %v1584_v51 }
 0x2fd   : > { %2071 = vmatmul.mubr.msk.bf16.vlgmr.msra.gmra.mxu1 %vm1261_vm14, %v2066_v50  ;;  %v1593_v2 = vsel %vm1265_vm13, %v1587_v61, 0 }
 0x2fe   : > { %1480 = vmatprep.mubr.bf16.mxu1 %v2188_v44  ;;  %v1436_v53 = vpop.permute.xlu1 %1435 }
 0x2ff   : > { %v1516_v52 = vpop.permute.xlu0 %1515 }
 0x302   : > { %v1742_v25 = vpop.permute.xlu1 %1741 }
 0x303   : > { %v1664_v54 = vpop.permute.xlu0 %1663 }
 0x306   : > { %v1432_v56 = vpop.permute.xlu1 %1431 }
 0x307   : > { %v1434_v55 = vpop.permute.xlu0 %1433 }
 0x308   : > { %v1438_v57 = vsel %vm523_vm9, %v1434_v55, %v1436_v53  ;;  %v1437_v58 = vsel %vm523_vm9, %v1432_v56, %v1434_v55 }
 0x309   : > { %v1443_v59 = vsel %vm1265_vm13, %v1437_v58, 0  ;;  %2082 = vmatprep.subr.msk.bf16.mxu1 %vm1265_vm13, %v1438_v57 }
 0x30a   : > { %1463 = vmatpush1.bf16.msra.mxu1 %v1443_v59  ;;  %v1514_v0 = vpop.permute.xlu1 %1513 }
 0x30b   : > { %v1512_v63 = vpop.permute.xlu0 %1511  ;;  %2094 = vmatprep.subr.msk.bf16.mxu1 %vm1265_vm13, %v1588_v60  ;;  %v1518_v1 = vsel %vm621_vm8, %v1514_v0, %v1516_v52 }
 0x30c   : > { %v1517_v26 = vsel %vm621_vm8, %v1512_v63, %v1514_v0  ;;  %2088 = vmatprep.subr.msk.bf16.mxu0 %vm1265_vm13, %v1518_v1 }
 0x30d   : > { %v1523_v3 = vsel %vm1265_vm13, %v1517_v26, 0  ;;  %2083 = vmatmul.mubr.msk.bf16.vlgmr.msra.gmra.mxu1 %vm1261_vm14, %v2078_v62 }
 0x30e   : > { %1543 = vmatpush1.bf16.msra.mxu0 %v1523_v3  ;;  %1613 = vmatpush1.bf16.msra.mxu1 %v1593_v2  ;;  %v1802_v6 = vpop.permute.xlu1 %1801 }
 0x30f   : > { %v1800_v5 = vpop.permute.xlu0 %1799  ;;  %1630 = vmatprep.mubr.bf16.mxu1 %v2188_v44 }
 0x310   : > { %v1805_v19 = vsel %vm2575_vm2, %v1800_v5, %v1802_v6 }
 0x311   : > { %2089 = vmatmul.mubr.msk.bf16.vlgmr.msra.gmra.mxu0 %vm1261_vm14, %v2084_v4  ;;  %v1811_v28 = vsel %vm1265_vm13, %v1805_v19, 0 }
 0x312   : > { %1708 = vmatprep.mubr.bf16.mxu0 %v2188_v44  ;;  %v1662_v9 = vpop.permute.xlu1 %1661 }
 0x313   : > { %v1660_v8 = vpop.permute.xlu0 %1659  ;;  %v1666_v11 = vsel %vm810_vm12, %v1662_v9, %v1664_v54 }
 0x314   : > { %v1665_v10 = vsel %vm810_vm12, %v1660_v8, %v1662_v9  ;;  %2100 = vmatprep.subr.msk.bf16.mxu0 %vm1265_vm13, %v1666_v11 }
 0x315   : > { %v1671_v12 = vsel %vm1265_vm13, %v1665_v10, 0  ;;  %2095 = vmatmul.mubr.msk.bf16.vlgmr.msra.gmra.mxu1 %vm1261_vm14, %v2090_v7 }
 0x316   : > { %1691 = vmatpush1.bf16.msra.mxu0 %v1671_v12  ;;  %1786 = vmatprep.mubr.bf16.mxu1 %v2188_v44  ;;  %v1738_v15 = vpop.permute.xlu1 %1737 }
 0x317   : > { %v1740_v14 = vpop.permute.xlu0 %1739 }
 0x318   : > { %v1744_v16 = vsel %vm908_vm11, %v1740_v14, %v1742_v25  ;;  %v1743_v17 = vsel %vm908_vm11, %v1738_v15, %v1740_v14  ;;  %v1057_v14 = vadd.f32 %v1051_v41, %v2414_v24 }
 0x319   : > { %v1749_v18 = vsel %vm1265_vm13, %v1743_v17, 0  ;;  %2101 = vmatmul.mubr.msk.bf16.vlgmr.msra.gmra.mxu0 %vm1261_vm14, %v2096_v13  ;;  %2106 = vmatprep.subr.msk.bf16.mxu1 %vm1265_vm13, %v1744_v16 }
 0x31a   : > { %1769 = vmatpush1.bf16.msra.mxu1 %v1749_v18  ;;  %1848 = vmatprep.mubr.bf16.mxu0 %v2188_v44  ;;  %v1878_v23 = vpop.permute.xlu1 %1877 }
 0x31b   : > { %v1804_v21 = vpop.permute.xlu0 %1803 }
 0x31c   : > { %v1806_v27 = vsel %vm2576_vm3, %v1802_v6, %v1804_v21 }
 0x31d   : > { %2107 = vmatmul.mubr.msk.bf16.vlgmr.msra.gmra.mxu1 %vm1261_vm14, %v2102_v20  ;;  %2109 = vmatprep.subr.msk.bf16.mxu0 %vm1265_vm13, %v1806_v27 }
 0x31e   : > { %1831 = vmatpush1.bf16.msra.mxu0 %v1811_v28  ;;  %1926 = vmatprep.mubr.bf16.mxu1 %v2188_v44  ;;  %v1882_v31 = vpop.permute.xlu1 %1881  ;;  %v1149_v44 = vpop.f32.mrf.mxu0 }
 0x31f   : > { %v1880_v30 = vpop.permute.xlu0 %1879  ;;  %v1155_v19 = vadd.f32 %v1149_v44, %v1057_v14 }
 0x320   : > { %v1883_v32 = vsel %vm2577_vm4, %v1878_v23, %v1880_v30  ;;  %v1884_v33 = vsel %vm2578_vm5, %v1880_v30, %v1882_v31 }
 0x321   : > { %v1889_v34 = vsel %vm1265_vm13, %v1883_v32, 0  ;;  %2110 = vmatmul.mubr.msk.bf16.vlgmr.msra.gmra.mxu0 %vm1261_vm14, %v2108_v29  ;;  %2115 = vmatprep.subr.msk.bf16.mxu1 %vm1265_vm13, %v1884_v33 }
 0x322   : > { %1909 = vmatpush1.bf16.msra.mxu1 %v1889_v34 }
 0x325   : > { %2116 = vmatmul.mubr.msk.bf16.vlgmr.msra.gmra.mxu1 %vm1261_vm14, %v2111_v35 }
 0x32b   : > { %v1949_v27 = vpop.permute.xlu1 %1948 }
 0x32c   : > { %v1941_v9 = vpop.permute.xlu0 %1940 }
 0x32d   : > { %v1943_v20 = vmul.f32 %v1941_v9, %v2416_v40  ;;  %v1944_v30 = vmul.f32 %v1941_v9, %v1155_v19 }
 0x347   : > { %v1361_v36 = vpop.f32.mrf.mxu0 }
 0x349   : > { %v1363_v37 = vpop.f32.mrf.mxu0 }
 0x34b   : > { %v1365_v38 = vpop.f32.mrf.mxu0 }
 0x34d   : > { %v1366_v39 = vpop.f32.mrf.mxu0 }
 0x3bd   : > { %v1306_v42 = vpop.f32.mrf.mxu1 }
 0x3be   : > { %v1362_v55 = vadd.f32 %v1361_v36, %v1306_v42 }
 0x3bf   : > { %v1308_v45 = vpop.f32.mrf.mxu1 }
 0x3c0   : > { %v1364_v58 = vadd.f32 %v1363_v37, %v1308_v45 }
 0x3c1   : > { %v1310_v46 = vpop.f32.mrf.mxu1 }
 0x3c3   : > { %v1311_v47 = vpop.f32.mrf.mxu1 }
 0x3cd   : > { %v1482_v48 = vpop.f32.mrf.mxu1 }
 0x3ce   : > { %v1489_v59 = vadd.f32 %v1482_v48, %v1362_v55 }
 0x3cf   : > { %v1484_v49 = vpop.f32.mrf.mxu1 }
 0x3d0   : > { %v1490_v62 = vadd.f32 %v1484_v49, %v1364_v58 }
 0x3d1   : > { %v1486_v22 = vpop.f32.mrf.mxu1  ;;  %v1562_v50 = vpop.f32.mrf.mxu0 }
 0x3d2   : > { %v1569_v63 = vadd.f32 %v1562_v50, %v1489_v59 }
 0x3d3   : > { %v1487_v51 = vpop.f32.mrf.mxu1  ;;  %v1564_v43 = vpop.f32.mrf.mxu0 }
 0x3d4   : > { %v1570_v1 = vadd.f32 %v1564_v43, %v1490_v62 }
 0x3d5   : > { %v1566_v52 = vpop.f32.mrf.mxu0  ;;  %v1632_v53 = vpop.f32.mrf.mxu1 }
 0x3d6   : > { %v1639_v2 = vadd.f32 %v1632_v53, %v1569_v63 }
 0x3d7   : > { %v1567_v54 = vpop.f32.mrf.mxu0  ;;  %v1634_v25 = vpop.f32.mrf.mxu1 }
 0x3d8   : > { %v1640_v5 = vadd.f32 %v1634_v25, %v1570_v1 }
 0x3d9   : > { %v1636_v56 = vpop.f32.mrf.mxu1  ;;  %v1710_v57 = vpop.f32.mrf.mxu0 }
 0x3da   : > { %v1717_v6 = vadd.f32 %v1710_v57, %v1639_v2 }
 0x3db   : > { %v1637_v60 = vpop.f32.mrf.mxu1  ;;  %v1712_v61 = vpop.f32.mrf.mxu0 }
 0x3dc   : > { %v1718_v10 = vadd.f32 %v1712_v61, %v1640_v5 }
 0x3dd   : > { %v1714_v0 = vpop.f32.mrf.mxu0  ;;  %v1788_v26 = vpop.f32.mrf.mxu1 }
 0x3de   : > { %v1795_v11 = vadd.f32 %v1788_v26, %v1717_v6 }
 0x3df   : > { %v1715_v3 = vpop.f32.mrf.mxu0  ;;  %v1790_v4 = vpop.f32.mrf.mxu1 }
 0x3e0   : > { %v1796_v15 = vadd.f32 %v1790_v4, %v1718_v10 }
 0x3e1   : > { %v1792_v7 = vpop.f32.mrf.mxu1  ;;  %v1850_v8 = vpop.f32.mrf.mxu0 }
 0x3e2   : > { %v1857_v16 = vadd.f32 %v1850_v8, %v1795_v11 }
 0x3e3   : > { %v1793_v12 = vpop.f32.mrf.mxu1  ;;  %v1852_v13 = vpop.f32.mrf.mxu0 }
 0x3e4   : > { %v1858_v21 = vadd.f32 %v1852_v13, %v1796_v15 }
 0x3e5   : > { %v1928_v17 = vpop.f32.mrf.mxu1  ;;  %v1854_v18 = vpop.f32.mrf.mxu0 }
 0x3e6   : > { %v1935_v23 = vadd.f32 %v1928_v17, %v1857_v16 }
 0x3e7   : > { %v1930_v28 = vpop.f32.mrf.mxu1  ;;  %v1855_v29 = vpop.f32.mrf.mxu0 }
 0x3e8   : > { %v1936_v31 = vadd.f32 %v1930_v28, %v1858_v21  ;;  %v1945_v32 = vadd.f32 %v1943_v20, %v1935_v23 }
 0x3e9   : > { %v1932_v33 = vpop.f32.mrf.mxu1 }
 0x3ea   : > { %v1946_v24 = vadd.f32 %v1944_v30, %v1936_v31  ;;  %v1951_v34 = vadd.f32 %v1949_v27, %v1945_v32 }
 0x3eb   : > { %v1933_v35 = vpop.f32.mrf.mxu1 }
 0x3ec   : > { %v1952_v44 = vadd.f32 %v1949_v27, %v1946_v24  ;;  %1953 = vst [vmem:[%s224_s25] sm:$0xff] %v1951_v34 }
 0x3ee   : > { %1954 = vst [vmem:[%s224_s25 + $0x8] sm:$0xff] %v1952_v44 }
 0x3ef PF: > { %s15_s18 = sadd.s32 1, %s2177_s18  }
 0x3f0   : > { %p12_p4 = scmp.ge.s32.totalorder %s15_s18, 4  }
 0x3f2   :  { %14 = sbr.rel (!%p12_p4) target bundleno = 1 (0x1), region = 86 }

</bundles_post_ra>
